<compile_context>
chip_gen: v7x
topology: tpu7x:2x2x1
jax: 0.10.0
libtpu: 0.0.40
codegen_flags: <defaults>
</compile_context>

<pallas_src>
import math
import jax
import jax.numpy as jnp
from jax.experimental import pallas as pl
from jax.experimental.pallas import tpu as pltpu

F32 = jnp.float32
LANES = 128


# ----------------------------- host-side constants -----------------------------

def positional_encoding(T, d_model):
    position = jnp.arange(T, dtype=F32)[:, None]
    div_term = jnp.exp(jnp.arange(0, d_model, 2, dtype=F32) * -(math.log(10000.0) / d_model))
    pe = jnp.zeros((T, d_model), F32)
    pe = pe.at[:, 0::2].set(jnp.sin(position * div_term))
    pe = pe.at[:, 1::2].set(jnp.cos(position * div_term))
    return pe


class _Slab:
    """Packs many small 2-D blocks into one lane-dense (rows, 128) f32 slab.

    add() returns (row_offset, rows, cols) for static in-kernel pl.ds slicing.
    """

    def __init__(self, row_align=8):
        self.row_align = row_align
        self._blocks = []
        self._rows = 0

    def add(self, w):
        w = jnp.asarray(w, F32)
        if w.ndim == 1:
            w = w[None, :]
        r, c = w.shape
        assert c <= LANES, (r, c)
        pad_r = (-r) % self.row_align
        self._blocks.append(jnp.pad(w, ((0, pad_r), (0, LANES - c))))
        off = self._rows
        self._rows += r + pad_r
        return (off, r, c)

    def build(self):
        return jnp.concatenate(self._blocks, axis=0)


# ----------------------------- fused Pallas kernel -----------------------------

def _make_kernel(lay, T, Ld, D, H):
    """One grid step == one batch element: full enc + dec forward in VMEM."""

    def kernel(denc_ref, ddec_ref, w_ref, c_ref, out_ref):
        def wblk(meta):                    # multi-row weight block (8-aligned rows)
            off, r, c = meta
            return w_ref[pl.ds(off, r), pl.ds(0, c)]

        def cblk(meta):                    # bias / LN / mask rows
            off, r, c = meta
            return c_ref[pl.ds(off, r), pl.ds(0, c)]

        def linear(x, wmeta, bmeta=None, relu=False):
            y = jnp.dot(x, wblk(wmeta), preferred_element_type=F32)
            if bmeta is not None:
                y = y + cblk(bmeta)        # (1, N) broadcast over rows
            if relu:
                y = jnp.maximum(y, 0.0)
            return y

        def layernorm(x, gmeta, bmeta):
            mu = jnp.mean(x, axis=-1, keepdims=True)
            xc = x - mu
            var = jnp.mean(xc * xc, axis=-1, keepdims=True)   # biased var (PyTorch LN)
            return xc * jax.lax.rsqrt(var + 1e-5) * cblk(gmeta) + cblk(bmeta)

        hm_off = lay["hmask"][0]

        def mha(q, k, v, causal):
            # Heads via 0/1 lane masks on K/V -> no sub-vreg slices, no concats.
            # s_h = q @ (k*m_h)^T == scale*(q_h @ k_h^T): 1/sqrt(E) pre-folded into
            # Wq/bq, and m_h is idempotent so masking K alone is exact.
            if causal:
                mask = cblk(lay["causal"])                     # (Lq, Lk) additive
            out = None
            for h in range(H):
                hm = c_ref[pl.ds(hm_off + h, 1), pl.ds(0, D)]  # (1, D) head mask
                kh = k * hm
                vh = v * hm
                s = jax.lax.dot_general(q, kh, (((1,), (1,)), ((), ())),
                                        preferred_element_type=F32)
                if causal:
                    s = s + mask
                m = jnp.max(s, axis=-1, keepdims=True)
                p = jnp.exp(s - m)
                p = p * pl.reciprocal(jnp.sum(p, axis=-1, keepdims=True), approx=True)
                oh = jnp.dot(p, vh, preferred_element_type=F32)
                out = oh if out is None else out + oh          # heads land in disjoint lanes
            return out

        def attention(xq, xkv, p, pfx, causal):
            q = linear(xq, p[pfx + "wq"], p[pfx + "bq"])       # scale already folded in
            k = linear(xkv, p[pfx + "wk"], p[pfx + "bk"])
            v = linear(xkv, p[pfx + "wv"], p[pfx + "bv"])
            return linear(mha(q, k, v, causal), p[pfx + "wo"], p[pfx + "bo"])

        # ===================== encoder path =====================
        # DataEmbedding (circular Conv1d k=3, no bias) + timeF Linear + PE, dropout p=0:
        # one matmul of the packed data slab with the identity-augmented weight block.
        enc = jnp.dot(denc_ref[...], wblk(lay["enc_emb"]), preferred_element_type=F32)

        for lp in lay["feature"]:
            # per-timestep attention with L=S=1: softmax over one key == 1, so
            # attn == out_proj(value_proj(x)); wq/wk drop out exactly.
            a = linear(linear(enc, lp["wv"], lp["bv"]), lp["wo"], lp["bo"])
            enc = layernorm(enc + a, lp["ng"], lp["nb"])
            f = linear(linear(enc, lp["f1w"], lp["f1b"], relu=True), lp["f2w"], lp["f2b"])
            enc = layernorm(enc + f, lp["ng"], lp["nb"])       # same LN reused (as in reference)

        for lp in lay["enc"]:                                  # conv1/conv2 are k=1 -> linear
            a = attention(enc, enc, lp, "", causal=False)
            enc = layernorm(enc + a, lp["n1g"], lp["n1b"])
            y = linear(linear(enc, lp["c1w"], lp["c1b"], relu=True), lp["c2w"], lp["c2b"])
            enc = layernorm(enc + y, lp["n2g"], lp["n2b"])
        enc = layernorm(enc, *lay["enc_norm"])                 # Encoder final norm

        # ===================== decoder path =====================
        dec = jnp.dot(ddec_ref[...], wblk(lay["dec_emb"]), preferred_element_type=F32)
        for lp in lay["dec"]:
            a = attention(dec, dec, lp, "s_", causal=True)
            dec = layernorm(dec + a, lp["n1g"], lp["n1b"])
            a = attention(dec, enc, lp, "c_", causal=False)
            dec = layernorm(dec + a, lp["n2g"], lp["n2b"])
            y = linear(linear(dec, lp["c1w"], lp["c1b"], relu=True), lp["c2w"], lp["c2b"])
            dec = layernorm(dec + y, lp["n3g"], lp["n3b"])
        dec = layernorm(dec, *lay["dec_norm"])                 # Decoder final norm

        out_ref[...] = linear(dec, lay["proj_w"], lay["proj_b"]).astype(out_ref.dtype)

    return kernel


# ----------------------------- wrapper -----------------------------

def make_forward(cfg, params):
    D = cfg["d_model"]
    H = cfg["n_heads"]
    E = D // H
    T = cfg["seq_len"]
    Ld = cfg["label_len"] + cfg["pred_len"]
    c_out = cfg["c_out"]
    scale = 1.0 / math.sqrt(E)
    assert T % 8 == 0 and Ld % 8 == 0, "per-batch row blocks must be sublane-aligned"

    W = _Slab(row_align=8)   # weight matrices (multi-row block reads)
    C = _Slab(row_align=1)   # biases / LN affines / masks (row reads)
    lay = {}

    # constants slab: causal mask first (multi-row block read at 8-aligned offset 0)
    idx = jnp.arange(Ld)
    lay["causal"] = C.add(jnp.where(idx[None, :] > idx[:, None], -1e9, 0.0).astype(F32))
    lay["hmask"] = C.add((jnp.arange(D)[None, :] // E ==
                          jnp.arange(H)[:, None]).astype(F32))           # (H, D) 0/1 masks

    # embeddings: [token_w ; timef_w ; I_D ; 0-pad] so embed == one matmul with the
    # [x(t-1)|x(t)|x(t+1)|mark|PE|0-pad] data slab.  token_w is the Conv1d weight
    # (d_model, c_in, 3) re-ordered to rows [W[:,:,0].T; W[:,:,1].T; W[:,:,2].T].
    def emb_block(p):
        blk = jnp.concatenate([jnp.asarray(p["token_w"], F32),
                               jnp.asarray(p["timef_w"], F32),
                               jnp.eye(D, dtype=F32)], axis=0)
        assert blk.shape[0] <= LANES
        return jnp.pad(blk, ((0, LANES - blk.shape[0]), (0, 0)))

    lay["enc_emb"] = W.add(emb_block(params["enc_emb"]))
    lay["dec_emb"] = W.add(emb_block(params["dec_emb"]))

    lay["feature"] = []
    for lp in params["feature_layers"]:
        a = lp["attn"]
        lay["feature"].append(dict(
            wv=W.add(a["wv"]), bv=C.add(a["bv"]),
            wo=W.add(a["wo"]), bo=C.add(a["bo"]),
            ng=C.add(lp["norm_g"]), nb=C.add(lp["norm_b"]),
            f1w=W.add(lp["ff1_w"]), f1b=C.add(lp["ff1_b"]),
            f2w=W.add(lp["ff2_w"]), f2b=C.add(lp["ff2_b"])))

    lay["enc"] = []
    for lp in params["enc_layers"]:
        a = lp["attn"]
        lay["enc"].append(dict(
            wq=W.add(a["wq"] * scale), bq=C.add(a["bq"] * scale),   # fold 1/sqrt(E)
            wk=W.add(a["wk"]), bk=C.add(a["bk"]),
            wv=W.add(a["wv"]), bv=C.add(a["bv"]),
            wo=W.add(a["wo"]), bo=C.add(a["bo"]),
            c1w=W.add(lp["conv1_w"]), c1b=C.add(lp["conv1_b"]),
            c2w=W.add(lp["conv2_w"]), c2b=C.add(lp["conv2_b"]),
            n1g=C.add(lp["norm1_g"]), n1b=C.add(lp["norm1_b"]),
            n2g=C.add(lp["norm2_g"]), n2b=C.add(lp["norm2_b"])))
    lay["enc_norm"] = (C.add(params["enc_norm_g"]), C.add(params["enc_norm_b"]))

    lay["dec"] = []
    for lp in params["dec_layers"]:
        sa, ca = lp["self_attn"], lp["cross_attn"]
        lay["dec"].append(dict(
            s_wq=W.add(sa["wq"] * scale), s_bq=C.add(sa["bq"] * scale),
            s_wk=W.add(sa["wk"]), s_bk=C.add(sa["bk"]),
            s_wv=W.add(sa["wv"]), s_bv=C.add(sa["bv"]),
            s_wo=W.add(sa["wo"]), s_bo=C.add(sa["bo"]),
            c_wq=W.add(ca["wq"] * scale), c_bq=C.add(ca["bq"] * scale),
            c_wk=W.add(ca["wk"]), c_bk=C.add(ca["bk"]),
            c_wv=W.add(ca["wv"]), c_bv=C.add(ca["bv"]),
            c_wo=W.add(ca["wo"]), c_bo=C.add(ca["bo"]),
            c1w=W.add(lp["conv1_w"]), c1b=C.add(lp["conv1_b"]),
            c2w=W.add(lp["conv2_w"]), c2b=C.add(lp["conv2_b"]),
            n1g=C.add(lp["norm1_g"]), n1b=C.add(lp["norm1_b"]),
            n2g=C.add(lp["norm2_g"]), n2b=C.add(lp["norm2_b"]),
            n3g=C.add(lp["norm3_g"]), n3b=C.add(lp["norm3_b"])))
    lay["dec_norm"] = (C.add(params["dec_norm_g"]), C.add(params["dec_norm_b"]))

    lay["proj_w"] = W.add(params["proj_w"])
    lay["proj_b"] = C.add(params["proj_b"])

    w_slab = W.build()     # (rows_w, 128) f32, ~0.5 MB, VMEM-resident
    c_slab = C.build()     # (rows_c, 128) f32, ~25 KB, VMEM-resident

    pe_enc = positional_encoding(T, D)
    pe_dec = positional_encoding(Ld, D)
    kernel = _make_kernel(lay, T, Ld, D, H)

    def data_slab(x, mark, pe, L):
        B = x.shape[0]
        d = jnp.concatenate(
            [jnp.roll(x, 1, axis=1), x, jnp.roll(x, -1, axis=1),   # circular conv taps
             mark, jnp.broadcast_to(pe[None], (B, L, D))], axis=-1).astype(F32)
        assert d.shape[-1] <= LANES
        d = jnp.pad(d, ((0, 0), (0, 0), (0, LANES - d.shape[-1])))
        return d.reshape(B * L, LANES)

    def forward(x_enc, x_mark_enc, x_dec, x_mark_dec):
        B = x_enc.shape[0]
        d_enc = data_slab(x_enc, x_mark_enc, pe_enc, T)     # (B*T,  128)
        d_dec = data_slab(x_dec, x_mark_dec, pe_dec, Ld)    # (B*Ld, 128)

        out = pl.pallas_call(
            kernel,
            out_shape=jax.ShapeDtypeStruct((B * Ld, c_out), F32),
            grid=(B,),
            in_specs=[
                pl.BlockSpec((T, LANES), lambda b: (b, 0)),      # per-batch enc data
                pl.BlockSpec((Ld, LANES), lambda b: (b, 0)),     # per-batch dec data
                pl.BlockSpec(w_slab.shape, lambda b: (0, 0)),    # resident weight slab
                pl.BlockSpec(c_slab.shape, lambda b: (0, 0)),    # resident constants slab
            ],
            out_specs=pl.BlockSpec((Ld, c_out), lambda b: (b, 0)),
            compiler_params=pltpu.CompilerParams(
                dimension_semantics=("parallel",)),              # 2nd TC on v7x
        )(d_enc, d_dec, w_slab, c_slab)
        return out.reshape(B, Ld, c_out)[:, -cfg["pred_len"]:, :]

    return forward


# ----------------------------- parameter init -----------------------------

def _w(key, i, o):
    return jax.random.normal(key, (i, o), F32) * 0.02


def _b(key, o):
    return jax.random.normal(key, (o,), F32) * 0.02


def _init_attn(key, d):
    ks = jax.random.split(key, 8)
    return {"wq": _w(ks[0], d, d), "bq": _b(ks[1], d),
            "wk": _w(ks[2], d, d), "bk": _b(ks[3], d),
            "wv": _w(ks[4], d, d), "bv": _b(ks[5], d),
            "wo": _w(ks[6], d, d), "bo": _b(ks[7], d)}


def init_params(key, cfg):
    D, dff = cfg["d_model"], cfg["d_ff"]
    n_feat = cfg["e_layers"] // 2
    n_enc = cfg["e_layers"] // 2
    n_dec = cfg["d_layers"]
    keys = iter(jax.random.split(key, 64))

    def emb_params(c_in):
        # token_w: Conv1d weight (d_model, c_in, 3) re-ordered to (3*c_in, d_model)
        # rows [W[:,:,0].T ; W[:,:,1].T ; W[:,:,2].T] matching [x(t-1)|x(t)|x(t+1)].
        return {"token_w": _w(next(keys), 3 * c_in, D),
                "timef_w": _w(next(keys), cfg["mark_in"], D)}

    params = {
        "enc_emb": emb_params(cfg["enc_in"]),
        "dec_emb": emb_params(cfg["dec_in"]),
        "feature_layers": [],
        "enc_layers": [],
        "dec_layers": [],
        "enc_norm_g": jnp.ones((D,), F32), "enc_norm_b": jnp.zeros((D,), F32),
        "dec_norm_g": jnp.ones((D,), F32), "dec_norm_b": jnp.zeros((D,), F32),
        "proj_w": _w(next(keys), D, cfg["c_out"]), "proj_b": _b(next(keys), cfg["c_out"]),
    }
    for _ in range(n_feat):
        params["feature_layers"].append({
            "attn": _init_attn(next(keys), D),
            "ff1_w": _w(next(keys), D, dff), "ff1_b": _b(next(keys), dff),
            "ff2_w": _w(next(keys), dff, D), "ff2_b": _b(next(keys), D),
            "norm_g": jnp.ones((D,), F32), "norm_b": jnp.zeros((D,), F32),
        })
    for _ in range(n_enc):
        params["enc_layers"].append({
            "attn": _init_attn(next(keys), D),
            "conv1_w": _w(next(keys), D, dff), "conv1_b": _b(next(keys), dff),
            "conv2_w": _w(next(keys), dff, D), "conv2_b": _b(next(keys), D),
            "norm1_g": jnp.ones((D,), F32), "norm1_b": jnp.zeros((D,), F32),
            "norm2_g": jnp.ones((D,), F32), "norm2_b": jnp.zeros((D,), F32),
        })
    for _ in range(n_dec):
        params["dec_layers"].append({
            "self_attn": _init_attn(next(keys), D),
            "cross_attn": _init_attn(next(keys), D),
            "conv1_w": _w(next(keys), D, dff), "conv1_b": _b(next(keys), dff),
            "conv2_w": _w(next(keys), dff, D), "conv2_b": _b(next(keys), D),
            "norm1_g": jnp.ones((D,), F32), "norm1_b": jnp.zeros((D,), F32),
            "norm2_g": jnp.ones((D,), F32), "norm2_b": jnp.zeros((D,), F32),
            "norm3_g": jnp.ones((D,), F32), "norm3_b": jnp.zeros((D,), F32),
        })
    return params


# ----------------------------- main -----------------------------

if __name__ == "__main__":
    cfg = dict(task_name="long_term_forecast",
               d_model=32, n_heads=4, d_ff=64,
               e_layers=2, d_layers=1,
               enc_in=4, dec_in=4, c_out=4, mark_in=4,
               seq_len=8, label_len=4, pred_len=4)

    key = jax.random.PRNGKey(0)
    kp, k1, k2, k3, k4 = jax.random.split(key, 5)
    params = init_params(kp, cfg)

    B = 2
    x_enc = jax.random.normal(k1, (B, cfg["seq_len"], cfg["enc_in"]), F32)
    x_mark_enc = jax.random.normal(k2, (B, cfg["seq_len"], cfg["mark_in"]), F32)
    dec_len = cfg["label_len"] + cfg["pred_len"]
    x_dec = jax.random.normal(k3, (B, dec_len, cfg["dec_in"]), F32)
    x_mark_dec = jax.random.normal(k4, (B, dec_len, cfg["mark_in"]), F32)

    forward = jax.jit(make_forward(cfg, params))
    out = forward(x_enc, x_mark_enc, x_dec, x_mark_dec)
    out = jax.block_until_ready(out)
    assert out.shape == (B, cfg["pred_len"], cfg["c_out"]), out.shape
    assert bool(jnp.all(jnp.isfinite(out)))
    print("KERNEL_OK")
</pallas_src>

<mosaic_0001>
module attributes {stable_mosaic.version = 11 : i64} {
  func.func @kernel(%arg0: i32, %arg1: memref<8x128xf32, #tpu.memory_space<vmem>>, %arg2: memref<8x128xf32, #tpu.memory_space<vmem>>, %arg3: memref<1024x128xf32, #tpu.memory_space<vmem>>, %arg4: memref<49x128xf32, #tpu.memory_space<vmem>>, %arg5: memref<8x4xf32, #tpu.memory_space<vmem>>) attributes {dimension_semantics = [#tpu.dimension_semantics<parallel>], iteration_bounds = array<i64: 2>, scalar_prefetch = 0 : i64, scratch_operands = 0 : i64, tpu.core_type = #tpu.core_type<tc>, window_params = [{transform_indices = @transform_0, window_bounds = array<i64: 8, 128>}, {transform_indices = @transform_1, window_bounds = array<i64: 8, 128>}, {pipeline_mode = #tpu.pipeline_mode<synchronous>, transform_indices = @transform_2, window_bounds = array<i64: 1024, 128>}, {pipeline_mode = #tpu.pipeline_mode<synchronous>, transform_indices = @transform_3, window_bounds = array<i64: 49, 128>}, {transform_indices = @transform_4, window_bounds = array<i64: 8, 4>}]} {
    %c0 = arith.constant 0 : index
    %c0_0 = arith.constant 0 : index
    %0 = vector.load %arg1[%c0, %c0_0] : memref<8x128xf32, #tpu.memory_space<vmem>>, vector<8x128xf32>
    %c0_1 = arith.constant 0 : index
    %c0_2 = arith.constant 0 : index
    %1 = vector.load %arg3[%c0_1, %c0_2] : memref<1024x128xf32, #tpu.memory_space<vmem>>, vector<128x32xf32>
    %cst = arith.constant dense<0.000000e+00> : vector<8x32xf32>
    %2 = tpu.matmul %0, %1, %cst {dimension_numbers = #tpu.dot_dimension_numbers<[1], [0], [0], [1], [0, 0, 1, 1], [], []>} : vector<8x128xf32>, vector<128x32xf32>, vector<8x32xf32> -> vector<8x32xf32>
    %c256 = arith.constant 256 : index
    %c0_3 = arith.constant 0 : index
    %3 = vector.load %arg3[%c256, %c0_3] : memref<1024x128xf32, #tpu.memory_space<vmem>>, vector<32x32xf32>
    %cst_4 = arith.constant dense<0.000000e+00> : vector<8x32xf32>
    %4 = tpu.matmul %2, %3, %cst_4 {dimension_numbers = #tpu.dot_dimension_numbers<[1], [0], [0], [1], [0, 0, 1, 1], [], []>} : vector<8x32xf32>, vector<32x32xf32>, vector<8x32xf32> -> vector<8x32xf32>
    %c12 = arith.constant 12 : index
    %c0_5 = arith.constant 0 : index
    %5 = vector.load %arg4[%c12, %c0_5] : memref<49x128xf32, #tpu.memory_space<vmem>>, vector<1x32xf32>
    %6 = vector.broadcast %5 : vector<1x32xf32> to vector<8x32xf32>
    %7 = arith.addf %4, %6 : vector<8x32xf32>
    %c288 = arith.constant 288 : index
    %c0_6 = arith.constant 0 : index
    %8 = vector.load %arg3[%c288, %c0_6] : memref<1024x128xf32, #tpu.memory_space<vmem>>, vector<32x32xf32>
    %cst_7 = arith.constant dense<0.000000e+00> : vector<8x32xf32>
    %9 = tpu.matmul %7, %8, %cst_7 {dimension_numbers = #tpu.dot_dimension_numbers<[1], [0], [0], [1], [0, 0, 1, 1], [], []>} : vector<8x32xf32>, vector<32x32xf32>, vector<8x32xf32> -> vector<8x32xf32>
    %c13 = arith.constant 13 : index
    %c0_8 = arith.constant 0 : index
    %10 = vector.load %arg4[%c13, %c0_8] : memref<49x128xf32, #tpu.memory_space<vmem>>, vector<1x32xf32>
    %11 = vector.broadcast %10 : vector<1x32xf32> to vector<8x32xf32>
    %12 = arith.addf %9, %11 : vector<8x32xf32>
    %13 = arith.addf %2, %12 : vector<8x32xf32>
    %cst_9 = arith.constant dense<0.000000e+00> : vector<8xf32>
    %14 = vector.multi_reduction <add>, %13, %cst_9 [1] : vector<8x32xf32> to vector<8xf32>
    %15 = vector.shape_cast %14 : vector<8xf32> to vector<8x1xf32>
    %cst_10 = arith.constant 3.200000e+01 : f32
    %16 = vector.broadcast %cst_10 : f32 to vector<8x1xf32>
    %17 = arith.divf %15, %16 : vector<8x1xf32>
    %18 = vector.broadcast %17 : vector<8x1xf32> to vector<8x32xf32>
    %19 = arith.subf %13, %18 : vector<8x32xf32>
    %20 = arith.mulf %19, %19 : vector<8x32xf32>
    %cst_11 = arith.constant dense<0.000000e+00> : vector<8xf32>
    %21 = vector.multi_reduction <add>, %20, %cst_11 [1] : vector<8x32xf32> to vector<8xf32>
    %22 = vector.shape_cast %21 : vector<8xf32> to vector<8x1xf32>
    %cst_12 = arith.constant 3.200000e+01 : f32
    %23 = vector.broadcast %cst_12 : f32 to vector<8x1xf32>
    %24 = arith.divf %22, %23 : vector<8x1xf32>
    %cst_13 = arith.constant 9.99999974E-6 : f32
    %25 = vector.broadcast %cst_13 : f32 to vector<8x1xf32>
    %26 = arith.addf %24, %25 : vector<8x1xf32>
    %27 = math.rsqrt %26 : vector<8x1xf32>
    %28 = vector.broadcast %27 : vector<8x1xf32> to vector<8x32xf32>
    %29 = arith.mulf %19, %28 : vector<8x32xf32>
    %c14 = arith.constant 14 : index
    %c0_14 = arith.constant 0 : index
    %30 = vector.load %arg4[%c14, %c0_14] : memref<49x128xf32, #tpu.memory_space<vmem>>, vector<1x32xf32>
    %31 = vector.broadcast %30 : vector<1x32xf32> to vector<8x32xf32>
    %32 = arith.mulf %29, %31 : vector<8x32xf32>
    %c15 = arith.constant 15 : index
    %c0_15 = arith.constant 0 : index
    %33 = vector.load %arg4[%c15, %c0_15] : memref<49x128xf32, #tpu.memory_space<vmem>>, vector<1x32xf32>
    %34 = vector.broadcast %33 : vector<1x32xf32> to vector<8x32xf32>
    %35 = arith.addf %32, %34 : vector<8x32xf32>
    %c320 = arith.constant 320 : index
    %c0_16 = arith.constant 0 : index
    %36 = vector.load %arg3[%c320, %c0_16] : memref<1024x128xf32, #tpu.memory_space<vmem>>, vector<32x64xf32>
    %cst_17 = arith.constant dense<0.000000e+00> : vector<8x64xf32>
    %37 = tpu.matmul %35, %36, %cst_17 {dimension_numbers = #tpu.dot_dimension_numbers<[1], [0], [0], [1], [0, 0, 1, 1], [], []>} : vector<8x32xf32>, vector<32x64xf32>, vector<8x64xf32> -> vector<8x64xf32>
    %c16 = arith.constant 16 : index
    %c0_18 = arith.constant 0 : index
    %38 = vector.load %arg4[%c16, %c0_18] : memref<49x128xf32, #tpu.memory_space<vmem>>, vector<1x64xf32>
    %39 = vector.broadcast %38 : vector<1x64xf32> to vector<8x64xf32>
    %40 = arith.addf %37, %39 : vector<8x64xf32>
    %cst_19 = arith.constant 0.000000e+00 : f32
    %41 = vector.broadcast %cst_19 : f32 to vector<8x64xf32>
    %42 = arith.maximumf %40, %41 : vector<8x64xf32>
    %c352 = arith.constant 352 : index
    %c0_20 = arith.constant 0 : index
    %43 = vector.load %arg3[%c352, %c0_20] : memref<1024x128xf32, #tpu.memory_space<vmem>>, vector<64x32xf32>
    %cst_21 = arith.constant dense<0.000000e+00> : vector<8x32xf32>
    %44 = tpu.matmul %42, %43, %cst_21 {dimension_numbers = #tpu.dot_dimension_numbers<[1], [0], [0], [1], [0, 0, 1, 1], [], []>} : vector<8x64xf32>, vector<64x32xf32>, vector<8x32xf32> -> vector<8x32xf32>
    %c17 = arith.constant 17 : index
    %c0_22 = arith.constant 0 : index
    %45 = vector.load %arg4[%c17, %c0_22] : memref<49x128xf32, #tpu.memory_space<vmem>>, vector<1x32xf32>
    %46 = vector.broadcast %45 : vector<1x32xf32> to vector<8x32xf32>
    %47 = arith.addf %44, %46 : vector<8x32xf32>
    %48 = arith.addf %35, %47 : vector<8x32xf32>
    %cst_23 = arith.constant dense<0.000000e+00> : vector<8xf32>
    %49 = vector.multi_reduction <add>, %48, %cst_23 [1] : vector<8x32xf32> to vector<8xf32>
    %50 = vector.shape_cast %49 : vector<8xf32> to vector<8x1xf32>
    %cst_24 = arith.constant 3.200000e+01 : f32
    %51 = vector.broadcast %cst_24 : f32 to vector<8x1xf32>
    %52 = arith.divf %50, %51 : vector<8x1xf32>
    %53 = vector.broadcast %52 : vector<8x1xf32> to vector<8x32xf32>
    %54 = arith.subf %48, %53 : vector<8x32xf32>
    %55 = arith.mulf %54, %54 : vector<8x32xf32>
    %cst_25 = arith.constant dense<0.000000e+00> : vector<8xf32>
    %56 = vector.multi_reduction <add>, %55, %cst_25 [1] : vector<8x32xf32> to vector<8xf32>
    %57 = vector.shape_cast %56 : vector<8xf32> to vector<8x1xf32>
    %cst_26 = arith.constant 3.200000e+01 : f32
    %58 = vector.broadcast %cst_26 : f32 to vector<8x1xf32>
    %59 = arith.divf %57, %58 : vector<8x1xf32>
    %cst_27 = arith.constant 9.99999974E-6 : f32
    %60 = vector.broadcast %cst_27 : f32 to vector<8x1xf32>
    %61 = arith.addf %59, %60 : vector<8x1xf32>
    %62 = math.rsqrt %61 : vector<8x1xf32>
    %63 = vector.broadcast %62 : vector<8x1xf32> to vector<8x32xf32>
    %64 = arith.mulf %54, %63 : vector<8x32xf32>
    %c14_28 = arith.constant 14 : index
    %c0_29 = arith.constant 0 : index
    %65 = vector.load %arg4[%c14_28, %c0_29] : memref<49x128xf32, #tpu.memory_space<vmem>>, vector<1x32xf32>
    %66 = vector.broadcast %65 : vector<1x32xf32> to vector<8x32xf32>
    %67 = arith.mulf %64, %66 : vector<8x32xf32>
    %c15_30 = arith.constant 15 : index
    %c0_31 = arith.constant 0 : index
    %68 = vector.load %arg4[%c15_30, %c0_31] : memref<49x128xf32, #tpu.memory_space<vmem>>, vector<1x32xf32>
    %69 = vector.broadcast %68 : vector<1x32xf32> to vector<8x32xf32>
    %70 = arith.addf %67, %69 : vector<8x32xf32>
    %c416 = arith.constant 416 : index
    %c0_32 = arith.constant 0 : index
    %71 = vector.load %arg3[%c416, %c0_32] : memref<1024x128xf32, #tpu.memory_space<vmem>>, vector<32x32xf32>
    %cst_33 = arith.constant dense<0.000000e+00> : vector<8x32xf32>
    %72 = tpu.matmul %70, %71, %cst_33 {dimension_numbers = #tpu.dot_dimension_numbers<[1], [0], [0], [1], [0, 0, 1, 1], [], []>} : vector<8x32xf32>, vector<32x32xf32>, vector<8x32xf32> -> vector<8x32xf32>
    %c18 = arith.constant 18 : index
    %c0_34 = arith.constant 0 : index
    %73 = vector.load %arg4[%c18, %c0_34] : memref<49x128xf32, #tpu.memory_space<vmem>>, vector<1x32xf32>
    %74 = vector.broadcast %73 : vector<1x32xf32> to vector<8x32xf32>
    %75 = arith.addf %72, %74 : vector<8x32xf32>
    %c448 = arith.constant 448 : index
    %c0_35 = arith.constant 0 : index
    %76 = vector.load %arg3[%c448, %c0_35] : memref<1024x128xf32, #tpu.memory_space<vmem>>, vector<32x32xf32>
    %cst_36 = arith.constant dense<0.000000e+00> : vector<8x32xf32>
    %77 = tpu.matmul %70, %76, %cst_36 {dimension_numbers = #tpu.dot_dimension_numbers<[1], [0], [0], [1], [0, 0, 1, 1], [], []>} : vector<8x32xf32>, vector<32x32xf32>, vector<8x32xf32> -> vector<8x32xf32>
    %c19 = arith.constant 19 : index
    %c0_37 = arith.constant 0 : index
    %78 = vector.load %arg4[%c19, %c0_37] : memref<49x128xf32, #tpu.memory_space<vmem>>, vector<1x32xf32>
    %79 = vector.broadcast %78 : vector<1x32xf32> to vector<8x32xf32>
    %80 = arith.addf %77, %79 : vector<8x32xf32>
    %c480 = arith.constant 480 : index
    %c0_38 = arith.constant 0 : index
    %81 = vector.load %arg3[%c480, %c0_38] : memref<1024x128xf32, #tpu.memory_space<vmem>>, vector<32x32xf32>
    %cst_39 = arith.constant dense<0.000000e+00> : vector<8x32xf32>
    %82 = tpu.matmul %70, %81, %cst_39 {dimension_numbers = #tpu.dot_dimension_numbers<[1], [0], [0], [1], [0, 0, 1, 1], [], []>} : vector<8x32xf32>, vector<32x32xf32>, vector<8x32xf32> -> vector<8x32xf32>
    %c20 = arith.constant 20 : index
    %c0_40 = arith.constant 0 : index
    %83 = vector.load %arg4[%c20, %c0_40] : memref<49x128xf32, #tpu.memory_space<vmem>>, vector<1x32xf32>
    %84 = vector.broadcast %83 : vector<1x32xf32> to vector<8x32xf32>
    %85 = arith.addf %82, %84 : vector<8x32xf32>
    %c8 = arith.constant 8 : index
    %c0_41 = arith.constant 0 : index
    %86 = vector.load %arg4[%c8, %c0_41] : memref<49x128xf32, #tpu.memory_space<vmem>>, vector<1x32xf32>
    %87 = vector.broadcast %86 : vector<1x32xf32> to vector<8x32xf32>
    %88 = arith.mulf %80, %87 : vector<8x32xf32>
    %89 = vector.broadcast %86 : vector<1x32xf32> to vector<8x32xf32>
    %90 = arith.mulf %85, %89 : vector<8x32xf32>
    %cst_42 = arith.constant dense<0.000000e+00> : vector<8x8xf32>
    %91 = tpu.matmul %75, %88, %cst_42 {dimension_numbers = #tpu.dot_dimension_numbers<[1], [1], [0], [0], [0, 0, 1, 0], [], []>} : vector<8x32xf32>, vector<8x32xf32>, vector<8x8xf32> -> vector<8x8xf32>
    %cst_43 = arith.constant dense<0xFF800000> : vector<8xf32>
    %92 = vector.multi_reduction <maximumf>, %91, %cst_43 [1] : vector<8x8xf32> to vector<8xf32>
    %93 = vector.shape_cast %92 : vector<8xf32> to vector<8x1xf32>
    %94 = vector.broadcast %93 : vector<8x1xf32> to vector<8x8xf32>
    %95 = arith.subf %91, %94 : vector<8x8xf32>
    %96 = math.exp %95 : vector<8x8xf32>
    %cst_44 = arith.constant dense<0.000000e+00> : vector<8xf32>
    %97 = vector.multi_reduction <add>, %96, %cst_44 [1] : vector<8x8xf32> to vector<8xf32>
    %98 = vector.shape_cast %97 : vector<8xf32> to vector<8x1xf32>
    %99 = tpu.reciprocal %98 {approx = true} : vector<8x1xf32> -> vector<8x1xf32>
    %100 = vector.broadcast %99 : vector<8x1xf32> to vector<8x8xf32>
    %101 = arith.mulf %96, %100 : vector<8x8xf32>
    %cst_45 = arith.constant dense<0.000000e+00> : vector<8x32xf32>
    %102 = tpu.matmul %101, %90, %cst_45 {dimension_numbers = #tpu.dot_dimension_numbers<[1], [0], [0], [1], [0, 0, 1, 1], [], []>} : vector<8x8xf32>, vector<8x32xf32>, vector<8x32xf32> -> vector<8x32xf32>
    %c9 = arith.constant 9 : index
    %c0_46 = arith.constant 0 : index
    %103 = vector.load %arg4[%c9, %c0_46] : memref<49x128xf32, #tpu.memory_space<vmem>>, vector<1x32xf32>
    %104 = vector.broadcast %103 : vector<1x32xf32> to vector<8x32xf32>
    %105 = arith.mulf %80, %104 : vector<8x32xf32>
    %106 = vector.broadcast %103 : vector<1x32xf32> to vector<8x32xf32>
    %107 = arith.mulf %85, %106 : vector<8x32xf32>
    %cst_47 = arith.constant dense<0.000000e+00> : vector<8x8xf32>
    %108 = tpu.matmul %75, %105, %cst_47 {dimension_numbers = #tpu.dot_dimension_numbers<[1], [1], [0], [0], [0, 0, 1, 0], [], []>} : vector<8x32xf32>, vector<8x32xf32>, vector<8x8xf32> -> vector<8x8xf32>
    %cst_48 = arith.constant dense<0xFF800000> : vector<8xf32>
    %109 = vector.multi_reduction <maximumf>, %108, %cst_48 [1] : vector<8x8xf32> to vector<8xf32>
    %110 = vector.shape_cast %109 : vector<8xf32> to vector<8x1xf32>
    %111 = vector.broadcast %110 : vector<8x1xf32> to vector<8x8xf32>
    %112 = arith.subf %108, %111 : vector<8x8xf32>
    %113 = math.exp %112 : vector<8x8xf32>
    %cst_49 = arith.constant dense<0.000000e+00> : vector<8xf32>
    %114 = vector.multi_reduction <add>, %113, %cst_49 [1] : vector<8x8xf32> to vector<8xf32>
    %115 = vector.shape_cast %114 : vector<8xf32> to vector<8x1xf32>
    %116 = tpu.reciprocal %115 {approx = true} : vector<8x1xf32> -> vector<8x1xf32>
    %117 = vector.broadcast %116 : vector<8x1xf32> to vector<8x8xf32>
    %118 = arith.mulf %113, %117 : vector<8x8xf32>
    %cst_50 = arith.constant dense<0.000000e+00> : vector<8x32xf32>
    %119 = tpu.matmul %118, %107, %cst_50 {dimension_numbers = #tpu.dot_dimension_numbers<[1], [0], [0], [1], [0, 0, 1, 1], [], []>} : vector<8x8xf32>, vector<8x32xf32>, vector<8x32xf32> -> vector<8x32xf32>
    %120 = arith.addf %102, %119 : vector<8x32xf32>
    %c10 = arith.constant 10 : index
    %c0_51 = arith.constant 0 : index
    %121 = vector.load %arg4[%c10, %c0_51] : memref<49x128xf32, #tpu.memory_space<vmem>>, vector<1x32xf32>
    %122 = vector.broadcast %121 : vector<1x32xf32> to vector<8x32xf32>
    %123 = arith.mulf %80, %122 : vector<8x32xf32>
    %124 = vector.broadcast %121 : vector<1x32xf32> to vector<8x32xf32>
    %125 = arith.mulf %85, %124 : vector<8x32xf32>
    %cst_52 = arith.constant dense<0.000000e+00> : vector<8x8xf32>
    %126 = tpu.matmul %75, %123, %cst_52 {dimension_numbers = #tpu.dot_dimension_numbers<[1], [1], [0], [0], [0, 0, 1, 0], [], []>} : vector<8x32xf32>, vector<8x32xf32>, vector<8x8xf32> -> vector<8x8xf32>
    %cst_53 = arith.constant dense<0xFF800000> : vector<8xf32>
    %127 = vector.multi_reduction <maximumf>, %126, %cst_53 [1] : vector<8x8xf32> to vector<8xf32>
    %128 = vector.shape_cast %127 : vector<8xf32> to vector<8x1xf32>
    %129 = vector.broadcast %128 : vector<8x1xf32> to vector<8x8xf32>
    %130 = arith.subf %126, %129 : vector<8x8xf32>
    %131 = math.exp %130 : vector<8x8xf32>
    %cst_54 = arith.constant dense<0.000000e+00> : vector<8xf32>
    %132 = vector.multi_reduction <add>, %131, %cst_54 [1] : vector<8x8xf32> to vector<8xf32>
    %133 = vector.shape_cast %132 : vector<8xf32> to vector<8x1xf32>
    %134 = tpu.reciprocal %133 {approx = true} : vector<8x1xf32> -> vector<8x1xf32>
    %135 = vector.broadcast %134 : vector<8x1xf32> to vector<8x8xf32>
    %136 = arith.mulf %131, %135 : vector<8x8xf32>
    %cst_55 = arith.constant dense<0.000000e+00> : vector<8x32xf32>
    %137 = tpu.matmul %136, %125, %cst_55 {dimension_numbers = #tpu.dot_dimension_numbers<[1], [0], [0], [1], [0, 0, 1, 1], [], []>} : vector<8x8xf32>, vector<8x32xf32>, vector<8x32xf32> -> vector<8x32xf32>
    %138 = arith.addf %120, %137 : vector<8x32xf32>
    %c11 = arith.constant 11 : index
    %c0_56 = arith.constant 0 : index
    %139 = vector.load %arg4[%c11, %c0_56] : memref<49x128xf32, #tpu.memory_space<vmem>>, vector<1x32xf32>
    %140 = vector.broadcast %139 : vector<1x32xf32> to vector<8x32xf32>
    %141 = arith.mulf %80, %140 : vector<8x32xf32>
    %142 = vector.broadcast %139 : vector<1x32xf32> to vector<8x32xf32>
    %143 = arith.mulf %85, %142 : vector<8x32xf32>
    %cst_57 = arith.constant dense<0.000000e+00> : vector<8x8xf32>
    %144 = tpu.matmul %75, %141, %cst_57 {dimension_numbers = #tpu.dot_dimension_numbers<[1], [1], [0], [0], [0, 0, 1, 0], [], []>} : vector<8x32xf32>, vector<8x32xf32>, vector<8x8xf32> -> vector<8x8xf32>
    %cst_58 = arith.constant dense<0xFF800000> : vector<8xf32>
    %145 = vector.multi_reduction <maximumf>, %144, %cst_58 [1] : vector<8x8xf32> to vector<8xf32>
    %146 = vector.shape_cast %145 : vector<8xf32> to vector<8x1xf32>
    %147 = vector.broadcast %146 : vector<8x1xf32> to vector<8x8xf32>
    %148 = arith.subf %144, %147 : vector<8x8xf32>
    %149 = math.exp %148 : vector<8x8xf32>
    %cst_59 = arith.constant dense<0.000000e+00> : vector<8xf32>
    %150 = vector.multi_reduction <add>, %149, %cst_59 [1] : vector<8x8xf32> to vector<8xf32>
    %151 = vector.shape_cast %150 : vector<8xf32> to vector<8x1xf32>
    %152 = tpu.reciprocal %151 {approx = true} : vector<8x1xf32> -> vector<8x1xf32>
    %153 = vector.broadcast %152 : vector<8x1xf32> to vector<8x8xf32>
    %154 = arith.mulf %149, %153 : vector<8x8xf32>
    %cst_60 = arith.constant dense<0.000000e+00> : vector<8x32xf32>
    %155 = tpu.matmul %154, %143, %cst_60 {dimension_numbers = #tpu.dot_dimension_numbers<[1], [0], [0], [1], [0, 0, 1, 1], [], []>} : vector<8x8xf32>, vector<8x32xf32>, vector<8x32xf32> -> vector<8x32xf32>
    %156 = arith.addf %138, %155 : vector<8x32xf32>
    %c512 = arith.constant 512 : index
    %c0_61 = arith.constant 0 : index
    %157 = vector.load %arg3[%c512, %c0_61] : memref<1024x128xf32, #tpu.memory_space<vmem>>, vector<32x32xf32>
    %cst_62 = arith.constant dense<0.000000e+00> : vector<8x32xf32>
    %158 = tpu.matmul %156, %157, %cst_62 {dimension_numbers = #tpu.dot_dimension_numbers<[1], [0], [0], [1], [0, 0, 1, 1], [], []>} : vector<8x32xf32>, vector<32x32xf32>, vector<8x32xf32> -> vector<8x32xf32>
    %c21 = arith.constant 21 : index
    %c0_63 = arith.constant 0 : index
    %159 = vector.load %arg4[%c21, %c0_63] : memref<49x128xf32, #tpu.memory_space<vmem>>, vector<1x32xf32>
    %160 = vector.broadcast %159 : vector<1x32xf32> to vector<8x32xf32>
    %161 = arith.addf %158, %160 : vector<8x32xf32>
    %162 = arith.addf %70, %161 : vector<8x32xf32>
    %cst_64 = arith.constant dense<0.000000e+00> : vector<8xf32>
    %163 = vector.multi_reduction <add>, %162, %cst_64 [1] : vector<8x32xf32> to vector<8xf32>
    %164 = vector.shape_cast %163 : vector<8xf32> to vector<8x1xf32>
    %cst_65 = arith.constant 3.200000e+01 : f32
    %165 = vector.broadcast %cst_65 : f32 to vector<8x1xf32>
    %166 = arith.divf %164, %165 : vector<8x1xf32>
    %167 = vector.broadcast %166 : vector<8x1xf32> to vector<8x32xf32>
    %168 = arith.subf %162, %167 : vector<8x32xf32>
    %169 = arith.mulf %168, %168 : vector<8x32xf32>
    %cst_66 = arith.constant dense<0.000000e+00> : vector<8xf32>
    %170 = vector.multi_reduction <add>, %169, %cst_66 [1] : vector<8x32xf32> to vector<8xf32>
    %171 = vector.shape_cast %170 : vector<8xf32> to vector<8x1xf32>
    %cst_67 = arith.constant 3.200000e+01 : f32
    %172 = vector.broadcast %cst_67 : f32 to vector<8x1xf32>
    %173 = arith.divf %171, %172 : vector<8x1xf32>
    %cst_68 = arith.constant 9.99999974E-6 : f32
    %174 = vector.broadcast %cst_68 : f32 to vector<8x1xf32>
    %175 = arith.addf %173, %174 : vector<8x1xf32>
    %176 = math.rsqrt %175 : vector<8x1xf32>
    %177 = vector.broadcast %176 : vector<8x1xf32> to vector<8x32xf32>
    %178 = arith.mulf %168, %177 : vector<8x32xf32>
    %c24 = arith.constant 24 : index
    %c0_69 = arith.constant 0 : index
    %179 = vector.load %arg4[%c24, %c0_69] : memref<49x128xf32, #tpu.memory_space<vmem>>, vector<1x32xf32>
    %180 = vector.broadcast %179 : vector<1x32xf32> to vector<8x32xf32>
    %181 = arith.mulf %178, %180 : vector<8x32xf32>
    %c25 = arith.constant 25 : index
    %c0_70 = arith.constant 0 : index
    %182 = vector.load %arg4[%c25, %c0_70] : memref<49x128xf32, #tpu.memory_space<vmem>>, vector<1x32xf32>
    %183 = vector.broadcast %182 : vector<1x32xf32> to vector<8x32xf32>
    %184 = arith.addf %181, %183 : vector<8x32xf32>
    %c544 = arith.constant 544 : index
    %c0_71 = arith.constant 0 : index
    %185 = vector.load %arg3[%c544, %c0_71] : memref<1024x128xf32, #tpu.memory_space<vmem>>, vector<32x64xf32>
    %cst_72 = arith.constant dense<0.000000e+00> : vector<8x64xf32>
    %186 = tpu.matmul %184, %185, %cst_72 {dimension_numbers = #tpu.dot_dimension_numbers<[1], [0], [0], [1], [0, 0, 1, 1], [], []>} : vector<8x32xf32>, vector<32x64xf32>, vector<8x64xf32> -> vector<8x64xf32>
    %c22 = arith.constant 22 : index
    %c0_73 = arith.constant 0 : index
    %187 = vector.load %arg4[%c22, %c0_73] : memref<49x128xf32, #tpu.memory_space<vmem>>, vector<1x64xf32>
    %188 = vector.broadcast %187 : vector<1x64xf32> to vector<8x64xf32>
    %189 = arith.addf %186, %188 : vector<8x64xf32>
    %cst_74 = arith.constant 0.000000e+00 : f32
    %190 = vector.broadcast %cst_74 : f32 to vector<8x64xf32>
    %191 = arith.maximumf %189, %190 : vector<8x64xf32>
    %c576 = arith.constant 576 : index
    %c0_75 = arith.constant 0 : index
    %192 = vector.load %arg3[%c576, %c0_75] : memref<1024x128xf32, #tpu.memory_space<vmem>>, vector<64x32xf32>
    %cst_76 = arith.constant dense<0.000000e+00> : vector<8x32xf32>
    %193 = tpu.matmul %191, %192, %cst_76 {dimension_numbers = #tpu.dot_dimension_numbers<[1], [0], [0], [1], [0, 0, 1, 1], [], []>} : vector<8x64xf32>, vector<64x32xf32>, vector<8x32xf32> -> vector<8x32xf32>
    %c23 = arith.constant 23 : index
    %c0_77 = arith.constant 0 : index
    %194 = vector.load %arg4[%c23, %c0_77] : memref<49x128xf32, #tpu.memory_space<vmem>>, vector<1x32xf32>
    %195 = vector.broadcast %194 : vector<1x32xf32> to vector<8x32xf32>
    %196 = arith.addf %193, %195 : vector<8x32xf32>
    %197 = arith.addf %184, %196 : vector<8x32xf32>
    %cst_78 = arith.constant dense<0.000000e+00> : vector<8xf32>
    %198 = vector.multi_reduction <add>, %197, %cst_78 [1] : vector<8x32xf32> to vector<8xf32>
    %199 = vector.shape_cast %198 : vector<8xf32> to vector<8x1xf32>
    %cst_79 = arith.constant 3.200000e+01 : f32
    %200 = vector.broadcast %cst_79 : f32 to vector<8x1xf32>
    %201 = arith.divf %199, %200 : vector<8x1xf32>
    %202 = vector.broadcast %201 : vector<8x1xf32> to vector<8x32xf32>
    %203 = arith.subf %197, %202 : vector<8x32xf32>
    %204 = arith.mulf %203, %203 : vector<8x32xf32>
    %cst_80 = arith.constant dense<0.000000e+00> : vector<8xf32>
    %205 = vector.multi_reduction <add>, %204, %cst_80 [1] : vector<8x32xf32> to vector<8xf32>
    %206 = vector.shape_cast %205 : vector<8xf32> to vector<8x1xf32>
    %cst_81 = arith.constant 3.200000e+01 : f32
    %207 = vector.broadcast %cst_81 : f32 to vector<8x1xf32>
    %208 = arith.divf %206, %207 : vector<8x1xf32>
    %cst_82 = arith.constant 9.99999974E-6 : f32
    %209 = vector.broadcast %cst_82 : f32 to vector<8x1xf32>
    %210 = arith.addf %208, %209 : vector<8x1xf32>
    %211 = math.rsqrt %210 : vector<8x1xf32>
    %212 = vector.broadcast %211 : vector<8x1xf32> to vector<8x32xf32>
    %213 = arith.mulf %203, %212 : vector<8x32xf32>
    %c26 = arith.constant 26 : index
    %c0_83 = arith.constant 0 : index
    %214 = vector.load %arg4[%c26, %c0_83] : memref<49x128xf32, #tpu.memory_space<vmem>>, vector<1x32xf32>
    %215 = vector.broadcast %214 : vector<1x32xf32> to vector<8x32xf32>
    %216 = arith.mulf %213, %215 : vector<8x32xf32>
    %c27 = arith.constant 27 : index
    %c0_84 = arith.constant 0 : index
    %217 = vector.load %arg4[%c27, %c0_84] : memref<49x128xf32, #tpu.memory_space<vmem>>, vector<1x32xf32>
    %218 = vector.broadcast %217 : vector<1x32xf32> to vector<8x32xf32>
    %219 = arith.addf %216, %218 : vector<8x32xf32>
    %cst_85 = arith.constant dense<0.000000e+00> : vector<8xf32>
    %220 = vector.multi_reduction <add>, %219, %cst_85 [1] : vector<8x32xf32> to vector<8xf32>
    %221 = vector.shape_cast %220 : vector<8xf32> to vector<8x1xf32>
    %cst_86 = arith.constant 3.200000e+01 : f32
    %222 = vector.broadcast %cst_86 : f32 to vector<8x1xf32>
    %223 = arith.divf %221, %222 : vector<8x1xf32>
    %224 = vector.broadcast %223 : vector<8x1xf32> to vector<8x32xf32>
    %225 = arith.subf %219, %224 : vector<8x32xf32>
    %226 = arith.mulf %225, %225 : vector<8x32xf32>
    %cst_87 = arith.constant dense<0.000000e+00> : vector<8xf32>
    %227 = vector.multi_reduction <add>, %226, %cst_87 [1] : vector<8x32xf32> to vector<8xf32>
    %228 = vector.shape_cast %227 : vector<8xf32> to vector<8x1xf32>
    %cst_88 = arith.constant 3.200000e+01 : f32
    %229 = vector.broadcast %cst_88 : f32 to vector<8x1xf32>
    %230 = arith.divf %228, %229 : vector<8x1xf32>
    %cst_89 = arith.constant 9.99999974E-6 : f32
    %231 = vector.broadcast %cst_89 : f32 to vector<8x1xf32>
    %232 = arith.addf %230, %231 : vector<8x1xf32>
    %233 = math.rsqrt %232 : vector<8x1xf32>
    %234 = vector.broadcast %233 : vector<8x1xf32> to vector<8x32xf32>
    %235 = arith.mulf %225, %234 : vector<8x32xf32>
    %c28 = arith.constant 28 : index
    %c0_90 = arith.constant 0 : index
    %236 = vector.load %arg4[%c28, %c0_90] : memref<49x128xf32, #tpu.memory_space<vmem>>, vector<1x32xf32>
    %237 = vector.broadcast %236 : vector<1x32xf32> to vector<8x32xf32>
    %238 = arith.mulf %235, %237 : vector<8x32xf32>
    %c29 = arith.constant 29 : index
    %c0_91 = arith.constant 0 : index
    %239 = vector.load %arg4[%c29, %c0_91] : memref<49x128xf32, #tpu.memory_space<vmem>>, vector<1x32xf32>
    %240 = vector.broadcast %239 : vector<1x32xf32> to vector<8x32xf32>
    %241 = arith.addf %238, %240 : vector<8x32xf32>
    %c0_92 = arith.constant 0 : index
    %c0_93 = arith.constant 0 : index
    %242 = vector.load %arg2[%c0_92, %c0_93] : memref<8x128xf32, #tpu.memory_space<vmem>>, vector<8x128xf32>
    %c128 = arith.constant 128 : index
    %c0_94 = arith.constant 0 : index
    %243 = vector.load %arg3[%c128, %c0_94] : memref<1024x128xf32, #tpu.memory_space<vmem>>, vector<128x32xf32>
    %cst_95 = arith.constant dense<0.000000e+00> : vector<8x32xf32>
    %244 = tpu.matmul %242, %243, %cst_95 {dimension_numbers = #tpu.dot_dimension_numbers<[1], [0], [0], [1], [0, 0, 1, 1], [], []>} : vector<8x128xf32>, vector<128x32xf32>, vector<8x32xf32> -> vector<8x32xf32>
    %c640 = arith.constant 640 : index
    %c0_96 = arith.constant 0 : index
    %245 = vector.load %arg3[%c640, %c0_96] : memref<1024x128xf32, #tpu.memory_space<vmem>>, vector<32x32xf32>
    %cst_97 = arith.constant dense<0.000000e+00> : vector<8x32xf32>
    %246 = tpu.matmul %244, %245, %cst_97 {dimension_numbers = #tpu.dot_dimension_numbers<[1], [0], [0], [1], [0, 0, 1, 1], [], []>} : vector<8x32xf32>, vector<32x32xf32>, vector<8x32xf32> -> vector<8x32xf32>
    %c30 = arith.constant 30 : index
    %c0_98 = arith.constant 0 : index
    %247 = vector.load %arg4[%c30, %c0_98] : memref<49x128xf32, #tpu.memory_space<vmem>>, vector<1x32xf32>
    %248 = vector.broadcast %247 : vector<1x32xf32> to vector<8x32xf32>
    %249 = arith.addf %246, %248 : vector<8x32xf32>
    %c672 = arith.constant 672 : index
    %c0_99 = arith.constant 0 : index
    %250 = vector.load %arg3[%c672, %c0_99] : memref<1024x128xf32, #tpu.memory_space<vmem>>, vector<32x32xf32>
    %cst_100 = arith.constant dense<0.000000e+00> : vector<8x32xf32>
    %251 = tpu.matmul %244, %250, %cst_100 {dimension_numbers = #tpu.dot_dimension_numbers<[1], [0], [0], [1], [0, 0, 1, 1], [], []>} : vector<8x32xf32>, vector<32x32xf32>, vector<8x32xf32> -> vector<8x32xf32>
    %c31 = arith.constant 31 : index
    %c0_101 = arith.constant 0 : index
    %252 = vector.load %arg4[%c31, %c0_101] : memref<49x128xf32, #tpu.memory_space<vmem>>, vector<1x32xf32>
    %253 = vector.broadcast %252 : vector<1x32xf32> to vector<8x32xf32>
    %254 = arith.addf %251, %253 : vector<8x32xf32>
    %c704 = arith.constant 704 : index
    %c0_102 = arith.constant 0 : index
    %255 = vector.load %arg3[%c704, %c0_102] : memref<1024x128xf32, #tpu.memory_space<vmem>>, vector<32x32xf32>
    %cst_103 = arith.constant dense<0.000000e+00> : vector<8x32xf32>
    %256 = tpu.matmul %244, %255, %cst_103 {dimension_numbers = #tpu.dot_dimension_numbers<[1], [0], [0], [1], [0, 0, 1, 1], [], []>} : vector<8x32xf32>, vector<32x32xf32>, vector<8x32xf32> -> vector<8x32xf32>
    %c32 = arith.constant 32 : index
    %c0_104 = arith.constant 0 : index
    %257 = vector.load %arg4[%c32, %c0_104] : memref<49x128xf32, #tpu.memory_space<vmem>>, vector<1x32xf32>
    %258 = vector.broadcast %257 : vector<1x32xf32> to vector<8x32xf32>
    %259 = arith.addf %256, %258 : vector<8x32xf32>
    %c0_105 = arith.constant 0 : index
    %c0_106 = arith.constant 0 : index
    %260 = vector.load %arg4[%c0_105, %c0_106] : memref<49x128xf32, #tpu.memory_space<vmem>>, vector<8x8xf32>
    %c8_107 = arith.constant 8 : index
    %c0_108 = arith.constant 0 : index
    %261 = vector.load %arg4[%c8_107, %c0_108] : memref<49x128xf32, #tpu.memory_space<vmem>>, vector<1x32xf32>
    %262 = vector.broadcast %261 : vector<1x32xf32> to vector<8x32xf32>
    %263 = arith.mulf %254, %262 : vector<8x32xf32>
    %264 = vector.broadcast %261 : vector<1x32xf32> to vector<8x32xf32>
    %265 = arith.mulf %259, %264 : vector<8x32xf32>
    %cst_109 = arith.constant dense<0.000000e+00> : vector<8x8xf32>
    %266 = tpu.matmul %249, %263, %cst_109 {dimension_numbers = #tpu.dot_dimension_numbers<[1], [1], [0], [0], [0, 0, 1, 0], [], []>} : vector<8x32xf32>, vector<8x32xf32>, vector<8x8xf32> -> vector<8x8xf32>
    %267 = arith.addf %266, %260 : vector<8x8xf32>
    %cst_110 = arith.constant dense<0xFF800000> : vector<8xf32>
    %268 = vector.multi_reduction <maximumf>, %267, %cst_110 [1] : vector<8x8xf32> to vector<8xf32>
    %269 = vector.shape_cast %268 : vector<8xf32> to vector<8x1xf32>
    %270 = vector.broadcast %269 : vector<8x1xf32> to vector<8x8xf32>
    %271 = arith.subf %267, %270 : vector<8x8xf32>
    %272 = math.exp %271 : vector<8x8xf32>
    %cst_111 = arith.constant dense<0.000000e+00> : vector<8xf32>
    %273 = vector.multi_reduction <add>, %272, %cst_111 [1] : vector<8x8xf32> to vector<8xf32>
    %274 = vector.shape_cast %273 : vector<8xf32> to vector<8x1xf32>
    %275 = tpu.reciprocal %274 {approx = true} : vector<8x1xf32> -> vector<8x1xf32>
    %276 = vector.broadcast %275 : vector<8x1xf32> to vector<8x8xf32>
    %277 = arith.mulf %272, %276 : vector<8x8xf32>
    %cst_112 = arith.constant dense<0.000000e+00> : vector<8x32xf32>
    %278 = tpu.matmul %277, %265, %cst_112 {dimension_numbers = #tpu.dot_dimension_numbers<[1], [0], [0], [1], [0, 0, 1, 1], [], []>} : vector<8x8xf32>, vector<8x32xf32>, vector<8x32xf32> -> vector<8x32xf32>
    %c9_113 = arith.constant 9 : index
    %c0_114 = arith.constant 0 : index
    %279 = vector.load %arg4[%c9_113, %c0_114] : memref<49x128xf32, #tpu.memory_space<vmem>>, vector<1x32xf32>
    %280 = vector.broadcast %279 : vector<1x32xf32> to vector<8x32xf32>
    %281 = arith.mulf %254, %280 : vector<8x32xf32>
    %282 = vector.broadcast %279 : vector<1x32xf32> to vector<8x32xf32>
    %283 = arith.mulf %259, %282 : vector<8x32xf32>
    %cst_115 = arith.constant dense<0.000000e+00> : vector<8x8xf32>
    %284 = tpu.matmul %249, %281, %cst_115 {dimension_numbers = #tpu.dot_dimension_numbers<[1], [1], [0], [0], [0, 0, 1, 0], [], []>} : vector<8x32xf32>, vector<8x32xf32>, vector<8x8xf32> -> vector<8x8xf32>
    %285 = arith.addf %284, %260 : vector<8x8xf32>
    %cst_116 = arith.constant dense<0xFF800000> : vector<8xf32>
    %286 = vector.multi_reduction <maximumf>, %285, %cst_116 [1] : vector<8x8xf32> to vector<8xf32>
    %287 = vector.shape_cast %286 : vector<8xf32> to vector<8x1xf32>
    %288 = vector.broadcast %287 : vector<8x1xf32> to vector<8x8xf32>
    %289 = arith.subf %285, %288 : vector<8x8xf32>
    %290 = math.exp %289 : vector<8x8xf32>
    %cst_117 = arith.constant dense<0.000000e+00> : vector<8xf32>
    %291 = vector.multi_reduction <add>, %290, %cst_117 [1] : vector<8x8xf32> to vector<8xf32>
    %292 = vector.shape_cast %291 : vector<8xf32> to vector<8x1xf32>
    %293 = tpu.reciprocal %292 {approx = true} : vector<8x1xf32> -> vector<8x1xf32>
    %294 = vector.broadcast %293 : vector<8x1xf32> to vector<8x8xf32>
    %295 = arith.mulf %290, %294 : vector<8x8xf32>
    %cst_118 = arith.constant dense<0.000000e+00> : vector<8x32xf32>
    %296 = tpu.matmul %295, %283, %cst_118 {dimension_numbers = #tpu.dot_dimension_numbers<[1], [0], [0], [1], [0, 0, 1, 1], [], []>} : vector<8x8xf32>, vector<8x32xf32>, vector<8x32xf32> -> vector<8x32xf32>
    %297 = arith.addf %278, %296 : vector<8x32xf32>
    %c10_119 = arith.constant 10 : index
    %c0_120 = arith.constant 0 : index
    %298 = vector.load %arg4[%c10_119, %c0_120] : memref<49x128xf32, #tpu.memory_space<vmem>>, vector<1x32xf32>
    %299 = vector.broadcast %298 : vector<1x32xf32> to vector<8x32xf32>
    %300 = arith.mulf %254, %299 : vector<8x32xf32>
    %301 = vector.broadcast %298 : vector<1x32xf32> to vector<8x32xf32>
    %302 = arith.mulf %259, %301 : vector<8x32xf32>
    %cst_121 = arith.constant dense<0.000000e+00> : vector<8x8xf32>
    %303 = tpu.matmul %249, %300, %cst_121 {dimension_numbers = #tpu.dot_dimension_numbers<[1], [1], [0], [0], [0, 0, 1, 0], [], []>} : vector<8x32xf32>, vector<8x32xf32>, vector<8x8xf32> -> vector<8x8xf32>
    %304 = arith.addf %303, %260 : vector<8x8xf32>
    %cst_122 = arith.constant dense<0xFF800000> : vector<8xf32>
    %305 = vector.multi_reduction <maximumf>, %304, %cst_122 [1] : vector<8x8xf32> to vector<8xf32>
    %306 = vector.shape_cast %305 : vector<8xf32> to vector<8x1xf32>
    %307 = vector.broadcast %306 : vector<8x1xf32> to vector<8x8xf32>
    %308 = arith.subf %304, %307 : vector<8x8xf32>
    %309 = math.exp %308 : vector<8x8xf32>
    %cst_123 = arith.constant dense<0.000000e+00> : vector<8xf32>
    %310 = vector.multi_reduction <add>, %309, %cst_123 [1] : vector<8x8xf32> to vector<8xf32>
    %311 = vector.shape_cast %310 : vector<8xf32> to vector<8x1xf32>
    %312 = tpu.reciprocal %311 {approx = true} : vector<8x1xf32> -> vector<8x1xf32>
    %313 = vector.broadcast %312 : vector<8x1xf32> to vector<8x8xf32>
    %314 = arith.mulf %309, %313 : vector<8x8xf32>
    %cst_124 = arith.constant dense<0.000000e+00> : vector<8x32xf32>
    %315 = tpu.matmul %314, %302, %cst_124 {dimension_numbers = #tpu.dot_dimension_numbers<[1], [0], [0], [1], [0, 0, 1, 1], [], []>} : vector<8x8xf32>, vector<8x32xf32>, vector<8x32xf32> -> vector<8x32xf32>
    %316 = arith.addf %297, %315 : vector<8x32xf32>
    %c11_125 = arith.constant 11 : index
    %c0_126 = arith.constant 0 : index
    %317 = vector.load %arg4[%c11_125, %c0_126] : memref<49x128xf32, #tpu.memory_space<vmem>>, vector<1x32xf32>
    %318 = vector.broadcast %317 : vector<1x32xf32> to vector<8x32xf32>
    %319 = arith.mulf %254, %318 : vector<8x32xf32>
    %320 = vector.broadcast %317 : vector<1x32xf32> to vector<8x32xf32>
    %321 = arith.mulf %259, %320 : vector<8x32xf32>
    %cst_127 = arith.constant dense<0.000000e+00> : vector<8x8xf32>
    %322 = tpu.matmul %249, %319, %cst_127 {dimension_numbers = #tpu.dot_dimension_numbers<[1], [1], [0], [0], [0, 0, 1, 0], [], []>} : vector<8x32xf32>, vector<8x32xf32>, vector<8x8xf32> -> vector<8x8xf32>
    %323 = arith.addf %322, %260 : vector<8x8xf32>
    %cst_128 = arith.constant dense<0xFF800000> : vector<8xf32>
    %324 = vector.multi_reduction <maximumf>, %323, %cst_128 [1] : vector<8x8xf32> to vector<8xf32>
    %325 = vector.shape_cast %324 : vector<8xf32> to vector<8x1xf32>
    %326 = vector.broadcast %325 : vector<8x1xf32> to vector<8x8xf32>
    %327 = arith.subf %323, %326 : vector<8x8xf32>
    %328 = math.exp %327 : vector<8x8xf32>
    %cst_129 = arith.constant dense<0.000000e+00> : vector<8xf32>
    %329 = vector.multi_reduction <add>, %328, %cst_129 [1] : vector<8x8xf32> to vector<8xf32>
    %330 = vector.shape_cast %329 : vector<8xf32> to vector<8x1xf32>
    %331 = tpu.reciprocal %330 {approx = true} : vector<8x1xf32> -> vector<8x1xf32>
    %332 = vector.broadcast %331 : vector<8x1xf32> to vector<8x8xf32>
    %333 = arith.mulf %328, %332 : vector<8x8xf32>
    %cst_130 = arith.constant dense<0.000000e+00> : vector<8x32xf32>
    %334 = tpu.matmul %333, %321, %cst_130 {dimension_numbers = #tpu.dot_dimension_numbers<[1], [0], [0], [1], [0, 0, 1, 1], [], []>} : vector<8x8xf32>, vector<8x32xf32>, vector<8x32xf32> -> vector<8x32xf32>
    %335 = arith.addf %316, %334 : vector<8x32xf32>
    %c736 = arith.constant 736 : index
    %c0_131 = arith.constant 0 : index
    %336 = vector.load %arg3[%c736, %c0_131] : memref<1024x128xf32, #tpu.memory_space<vmem>>, vector<32x32xf32>
    %cst_132 = arith.constant dense<0.000000e+00> : vector<8x32xf32>
    %337 = tpu.matmul %335, %336, %cst_132 {dimension_numbers = #tpu.dot_dimension_numbers<[1], [0], [0], [1], [0, 0, 1, 1], [], []>} : vector<8x32xf32>, vector<32x32xf32>, vector<8x32xf32> -> vector<8x32xf32>
    %c33 = arith.constant 33 : index
    %c0_133 = arith.constant 0 : index
    %338 = vector.load %arg4[%c33, %c0_133] : memref<49x128xf32, #tpu.memory_space<vmem>>, vector<1x32xf32>
    %339 = vector.broadcast %338 : vector<1x32xf32> to vector<8x32xf32>
    %340 = arith.addf %337, %339 : vector<8x32xf32>
    %341 = arith.addf %244, %340 : vector<8x32xf32>
    %cst_134 = arith.constant dense<0.000000e+00> : vector<8xf32>
    %342 = vector.multi_reduction <add>, %341, %cst_134 [1] : vector<8x32xf32> to vector<8xf32>
    %343 = vector.shape_cast %342 : vector<8xf32> to vector<8x1xf32>
    %cst_135 = arith.constant 3.200000e+01 : f32
    %344 = vector.broadcast %cst_135 : f32 to vector<8x1xf32>
    %345 = arith.divf %343, %344 : vector<8x1xf32>
    %346 = vector.broadcast %345 : vector<8x1xf32> to vector<8x32xf32>
    %347 = arith.subf %341, %346 : vector<8x32xf32>
    %348 = arith.mulf %347, %347 : vector<8x32xf32>
    %cst_136 = arith.constant dense<0.000000e+00> : vector<8xf32>
    %349 = vector.multi_reduction <add>, %348, %cst_136 [1] : vector<8x32xf32> to vector<8xf32>
    %350 = vector.shape_cast %349 : vector<8xf32> to vector<8x1xf32>
    %cst_137 = arith.constant 3.200000e+01 : f32
    %351 = vector.broadcast %cst_137 : f32 to vector<8x1xf32>
    %352 = arith.divf %350, %351 : vector<8x1xf32>
    %cst_138 = arith.constant 9.99999974E-6 : f32
    %353 = vector.broadcast %cst_138 : f32 to vector<8x1xf32>
    %354 = arith.addf %352, %353 : vector<8x1xf32>
    %355 = math.rsqrt %354 : vector<8x1xf32>
    %356 = vector.broadcast %355 : vector<8x1xf32> to vector<8x32xf32>
    %357 = arith.mulf %347, %356 : vector<8x32xf32>
    %c40 = arith.constant 40 : index
    %c0_139 = arith.constant 0 : index
    %358 = vector.load %arg4[%c40, %c0_139] : memref<49x128xf32, #tpu.memory_space<vmem>>, vector<1x32xf32>
    %359 = vector.broadcast %358 : vector<1x32xf32> to vector<8x32xf32>
    %360 = arith.mulf %357, %359 : vector<8x32xf32>
    %c41 = arith.constant 41 : index
    %c0_140 = arith.constant 0 : index
    %361 = vector.load %arg4[%c41, %c0_140] : memref<49x128xf32, #tpu.memory_space<vmem>>, vector<1x32xf32>
    %362 = vector.broadcast %361 : vector<1x32xf32> to vector<8x32xf32>
    %363 = arith.addf %360, %362 : vector<8x32xf32>
    %c768 = arith.constant 768 : index
    %c0_141 = arith.constant 0 : index
    %364 = vector.load %arg3[%c768, %c0_141] : memref<1024x128xf32, #tpu.memory_space<vmem>>, vector<32x32xf32>
    %cst_142 = arith.constant dense<0.000000e+00> : vector<8x32xf32>
    %365 = tpu.matmul %363, %364, %cst_142 {dimension_numbers = #tpu.dot_dimension_numbers<[1], [0], [0], [1], [0, 0, 1, 1], [], []>} : vector<8x32xf32>, vector<32x32xf32>, vector<8x32xf32> -> vector<8x32xf32>
    %c34 = arith.constant 34 : index
    %c0_143 = arith.constant 0 : index
    %366 = vector.load %arg4[%c34, %c0_143] : memref<49x128xf32, #tpu.memory_space<vmem>>, vector<1x32xf32>
    %367 = vector.broadcast %366 : vector<1x32xf32> to vector<8x32xf32>
    %368 = arith.addf %365, %367 : vector<8x32xf32>
    %c800 = arith.constant 800 : index
    %c0_144 = arith.constant 0 : index
    %369 = vector.load %arg3[%c800, %c0_144] : memref<1024x128xf32, #tpu.memory_space<vmem>>, vector<32x32xf32>
    %cst_145 = arith.constant dense<0.000000e+00> : vector<8x32xf32>
    %370 = tpu.matmul %241, %369, %cst_145 {dimension_numbers = #tpu.dot_dimension_numbers<[1], [0], [0], [1], [0, 0, 1, 1], [], []>} : vector<8x32xf32>, vector<32x32xf32>, vector<8x32xf32> -> vector<8x32xf32>
    %c35 = arith.constant 35 : index
    %c0_146 = arith.constant 0 : index
    %371 = vector.load %arg4[%c35, %c0_146] : memref<49x128xf32, #tpu.memory_space<vmem>>, vector<1x32xf32>
    %372 = vector.broadcast %371 : vector<1x32xf32> to vector<8x32xf32>
    %373 = arith.addf %370, %372 : vector<8x32xf32>
    %c832 = arith.constant 832 : index
    %c0_147 = arith.constant 0 : index
    %374 = vector.load %arg3[%c832, %c0_147] : memref<1024x128xf32, #tpu.memory_space<vmem>>, vector<32x32xf32>
    %cst_148 = arith.constant dense<0.000000e+00> : vector<8x32xf32>
    %375 = tpu.matmul %241, %374, %cst_148 {dimension_numbers = #tpu.dot_dimension_numbers<[1], [0], [0], [1], [0, 0, 1, 1], [], []>} : vector<8x32xf32>, vector<32x32xf32>, vector<8x32xf32> -> vector<8x32xf32>
    %c36 = arith.constant 36 : index
    %c0_149 = arith.constant 0 : index
    %376 = vector.load %arg4[%c36, %c0_149] : memref<49x128xf32, #tpu.memory_space<vmem>>, vector<1x32xf32>
    %377 = vector.broadcast %376 : vector<1x32xf32> to vector<8x32xf32>
    %378 = arith.addf %375, %377 : vector<8x32xf32>
    %c8_150 = arith.constant 8 : index
    %c0_151 = arith.constant 0 : index
    %379 = vector.load %arg4[%c8_150, %c0_151] : memref<49x128xf32, #tpu.memory_space<vmem>>, vector<1x32xf32>
    %380 = vector.broadcast %379 : vector<1x32xf32> to vector<8x32xf32>
    %381 = arith.mulf %373, %380 : vector<8x32xf32>
    %382 = vector.broadcast %379 : vector<1x32xf32> to vector<8x32xf32>
    %383 = arith.mulf %378, %382 : vector<8x32xf32>
    %cst_152 = arith.constant dense<0.000000e+00> : vector<8x8xf32>
    %384 = tpu.matmul %368, %381, %cst_152 {dimension_numbers = #tpu.dot_dimension_numbers<[1], [1], [0], [0], [0, 0, 1, 0], [], []>} : vector<8x32xf32>, vector<8x32xf32>, vector<8x8xf32> -> vector<8x8xf32>
    %cst_153 = arith.constant dense<0xFF800000> : vector<8xf32>
    %385 = vector.multi_reduction <maximumf>, %384, %cst_153 [1] : vector<8x8xf32> to vector<8xf32>
    %386 = vector.shape_cast %385 : vector<8xf32> to vector<8x1xf32>
    %387 = vector.broadcast %386 : vector<8x1xf32> to vector<8x8xf32>
    %388 = arith.subf %384, %387 : vector<8x8xf32>
    %389 = math.exp %388 : vector<8x8xf32>
    %cst_154 = arith.constant dense<0.000000e+00> : vector<8xf32>
    %390 = vector.multi_reduction <add>, %389, %cst_154 [1] : vector<8x8xf32> to vector<8xf32>
    %391 = vector.shape_cast %390 : vector<8xf32> to vector<8x1xf32>
    %392 = tpu.reciprocal %391 {approx = true} : vector<8x1xf32> -> vector<8x1xf32>
    %393 = vector.broadcast %392 : vector<8x1xf32> to vector<8x8xf32>
    %394 = arith.mulf %389, %393 : vector<8x8xf32>
    %cst_155 = arith.constant dense<0.000000e+00> : vector<8x32xf32>
    %395 = tpu.matmul %394, %383, %cst_155 {dimension_numbers = #tpu.dot_dimension_numbers<[1], [0], [0], [1], [0, 0, 1, 1], [], []>} : vector<8x8xf32>, vector<8x32xf32>, vector<8x32xf32> -> vector<8x32xf32>
    %c9_156 = arith.constant 9 : index
    %c0_157 = arith.constant 0 : index
    %396 = vector.load %arg4[%c9_156, %c0_157] : memref<49x128xf32, #tpu.memory_space<vmem>>, vector<1x32xf32>
    %397 = vector.broadcast %396 : vector<1x32xf32> to vector<8x32xf32>
    %398 = arith.mulf %373, %397 : vector<8x32xf32>
    %399 = vector.broadcast %396 : vector<1x32xf32> to vector<8x32xf32>
    %400 = arith.mulf %378, %399 : vector<8x32xf32>
    %cst_158 = arith.constant dense<0.000000e+00> : vector<8x8xf32>
    %401 = tpu.matmul %368, %398, %cst_158 {dimension_numbers = #tpu.dot_dimension_numbers<[1], [1], [0], [0], [0, 0, 1, 0], [], []>} : vector<8x32xf32>, vector<8x32xf32>, vector<8x8xf32> -> vector<8x8xf32>
    %cst_159 = arith.constant dense<0xFF800000> : vector<8xf32>
    %402 = vector.multi_reduction <maximumf>, %401, %cst_159 [1] : vector<8x8xf32> to vector<8xf32>
    %403 = vector.shape_cast %402 : vector<8xf32> to vector<8x1xf32>
    %404 = vector.broadcast %403 : vector<8x1xf32> to vector<8x8xf32>
    %405 = arith.subf %401, %404 : vector<8x8xf32>
    %406 = math.exp %405 : vector<8x8xf32>
    %cst_160 = arith.constant dense<0.000000e+00> : vector<8xf32>
    %407 = vector.multi_reduction <add>, %406, %cst_160 [1] : vector<8x8xf32> to vector<8xf32>
    %408 = vector.shape_cast %407 : vector<8xf32> to vector<8x1xf32>
    %409 = tpu.reciprocal %408 {approx = true} : vector<8x1xf32> -> vector<8x1xf32>
    %410 = vector.broadcast %409 : vector<8x1xf32> to vector<8x8xf32>
    %411 = arith.mulf %406, %410 : vector<8x8xf32>
    %cst_161 = arith.constant dense<0.000000e+00> : vector<8x32xf32>
    %412 = tpu.matmul %411, %400, %cst_161 {dimension_numbers = #tpu.dot_dimension_numbers<[1], [0], [0], [1], [0, 0, 1, 1], [], []>} : vector<8x8xf32>, vector<8x32xf32>, vector<8x32xf32> -> vector<8x32xf32>
    %413 = arith.addf %395, %412 : vector<8x32xf32>
    %c10_162 = arith.constant 10 : index
    %c0_163 = arith.constant 0 : index
    %414 = vector.load %arg4[%c10_162, %c0_163] : memref<49x128xf32, #tpu.memory_space<vmem>>, vector<1x32xf32>
    %415 = vector.broadcast %414 : vector<1x32xf32> to vector<8x32xf32>
    %416 = arith.mulf %373, %415 : vector<8x32xf32>
    %417 = vector.broadcast %414 : vector<1x32xf32> to vector<8x32xf32>
    %418 = arith.mulf %378, %417 : vector<8x32xf32>
    %cst_164 = arith.constant dense<0.000000e+00> : vector<8x8xf32>
    %419 = tpu.matmul %368, %416, %cst_164 {dimension_numbers = #tpu.dot_dimension_numbers<[1], [1], [0], [0], [0, 0, 1, 0], [], []>} : vector<8x32xf32>, vector<8x32xf32>, vector<8x8xf32> -> vector<8x8xf32>
    %cst_165 = arith.constant dense<0xFF800000> : vector<8xf32>
    %420 = vector.multi_reduction <maximumf>, %419, %cst_165 [1] : vector<8x8xf32> to vector<8xf32>
    %421 = vector.shape_cast %420 : vector<8xf32> to vector<8x1xf32>
    %422 = vector.broadcast %421 : vector<8x1xf32> to vector<8x8xf32>
    %423 = arith.subf %419, %422 : vector<8x8xf32>
    %424 = math.exp %423 : vector<8x8xf32>
    %cst_166 = arith.constant dense<0.000000e+00> : vector<8xf32>
    %425 = vector.multi_reduction <add>, %424, %cst_166 [1] : vector<8x8xf32> to vector<8xf32>
    %426 = vector.shape_cast %425 : vector<8xf32> to vector<8x1xf32>
    %427 = tpu.reciprocal %426 {approx = true} : vector<8x1xf32> -> vector<8x1xf32>
    %428 = vector.broadcast %427 : vector<8x1xf32> to vector<8x8xf32>
    %429 = arith.mulf %424, %428 : vector<8x8xf32>
    %cst_167 = arith.constant dense<0.000000e+00> : vector<8x32xf32>
    %430 = tpu.matmul %429, %418, %cst_167 {dimension_numbers = #tpu.dot_dimension_numbers<[1], [0], [0], [1], [0, 0, 1, 1], [], []>} : vector<8x8xf32>, vector<8x32xf32>, vector<8x32xf32> -> vector<8x32xf32>
    %431 = arith.addf %413, %430 : vector<8x32xf32>
    %c11_168 = arith.constant 11 : index
    %c0_169 = arith.constant 0 : index
    %432 = vector.load %arg4[%c11_168, %c0_169] : memref<49x128xf32, #tpu.memory_space<vmem>>, vector<1x32xf32>
    %433 = vector.broadcast %432 : vector<1x32xf32> to vector<8x32xf32>
    %434 = arith.mulf %373, %433 : vector<8x32xf32>
    %435 = vector.broadcast %432 : vector<1x32xf32> to vector<8x32xf32>
    %436 = arith.mulf %378, %435 : vector<8x32xf32>
    %cst_170 = arith.constant dense<0.000000e+00> : vector<8x8xf32>
    %437 = tpu.matmul %368, %434, %cst_170 {dimension_numbers = #tpu.dot_dimension_numbers<[1], [1], [0], [0], [0, 0, 1, 0], [], []>} : vector<8x32xf32>, vector<8x32xf32>, vector<8x8xf32> -> vector<8x8xf32>
    %cst_171 = arith.constant dense<0xFF800000> : vector<8xf32>
    %438 = vector.multi_reduction <maximumf>, %437, %cst_171 [1] : vector<8x8xf32> to vector<8xf32>
    %439 = vector.shape_cast %438 : vector<8xf32> to vector<8x1xf32>
    %440 = vector.broadcast %439 : vector<8x1xf32> to vector<8x8xf32>
    %441 = arith.subf %437, %440 : vector<8x8xf32>
    %442 = math.exp %441 : vector<8x8xf32>
    %cst_172 = arith.constant dense<0.000000e+00> : vector<8xf32>
    %443 = vector.multi_reduction <add>, %442, %cst_172 [1] : vector<8x8xf32> to vector<8xf32>
    %444 = vector.shape_cast %443 : vector<8xf32> to vector<8x1xf32>
    %445 = tpu.reciprocal %444 {approx = true} : vector<8x1xf32> -> vector<8x1xf32>
    %446 = vector.broadcast %445 : vector<8x1xf32> to vector<8x8xf32>
    %447 = arith.mulf %442, %446 : vector<8x8xf32>
    %cst_173 = arith.constant dense<0.000000e+00> : vector<8x32xf32>
    %448 = tpu.matmul %447, %436, %cst_173 {dimension_numbers = #tpu.dot_dimension_numbers<[1], [0], [0], [1], [0, 0, 1, 1], [], []>} : vector<8x8xf32>, vector<8x32xf32>, vector<8x32xf32> -> vector<8x32xf32>
    %449 = arith.addf %431, %448 : vector<8x32xf32>
    %c864 = arith.constant 864 : index
    %c0_174 = arith.constant 0 : index
    %450 = vector.load %arg3[%c864, %c0_174] : memref<1024x128xf32, #tpu.memory_space<vmem>>, vector<32x32xf32>
    %cst_175 = arith.constant dense<0.000000e+00> : vector<8x32xf32>
    %451 = tpu.matmul %449, %450, %cst_175 {dimension_numbers = #tpu.dot_dimension_numbers<[1], [0], [0], [1], [0, 0, 1, 1], [], []>} : vector<8x32xf32>, vector<32x32xf32>, vector<8x32xf32> -> vector<8x32xf32>
    %c37 = arith.constant 37 : index
    %c0_176 = arith.constant 0 : index
    %452 = vector.load %arg4[%c37, %c0_176] : memref<49x128xf32, #tpu.memory_space<vmem>>, vector<1x32xf32>
    %453 = vector.broadcast %452 : vector<1x32xf32> to vector<8x32xf32>
    %454 = arith.addf %451, %453 : vector<8x32xf32>
    %455 = arith.addf %363, %454 : vector<8x32xf32>
    %cst_177 = arith.constant dense<0.000000e+00> : vector<8xf32>
    %456 = vector.multi_reduction <add>, %455, %cst_177 [1] : vector<8x32xf32> to vector<8xf32>
    %457 = vector.shape_cast %456 : vector<8xf32> to vector<8x1xf32>
    %cst_178 = arith.constant 3.200000e+01 : f32
    %458 = vector.broadcast %cst_178 : f32 to vector<8x1xf32>
    %459 = arith.divf %457, %458 : vector<8x1xf32>
    %460 = vector.broadcast %459 : vector<8x1xf32> to vector<8x32xf32>
    %461 = arith.subf %455, %460 : vector<8x32xf32>
    %462 = arith.mulf %461, %461 : vector<8x32xf32>
    %cst_179 = arith.constant dense<0.000000e+00> : vector<8xf32>
    %463 = vector.multi_reduction <add>, %462, %cst_179 [1] : vector<8x32xf32> to vector<8xf32>
    %464 = vector.shape_cast %463 : vector<8xf32> to vector<8x1xf32>
    %cst_180 = arith.constant 3.200000e+01 : f32
    %465 = vector.broadcast %cst_180 : f32 to vector<8x1xf32>
    %466 = arith.divf %464, %465 : vector<8x1xf32>
    %cst_181 = arith.constant 9.99999974E-6 : f32
    %467 = vector.broadcast %cst_181 : f32 to vector<8x1xf32>
    %468 = arith.addf %466, %467 : vector<8x1xf32>
    %469 = math.rsqrt %468 : vector<8x1xf32>
    %470 = vector.broadcast %469 : vector<8x1xf32> to vector<8x32xf32>
    %471 = arith.mulf %461, %470 : vector<8x32xf32>
    %c42 = arith.constant 42 : index
    %c0_182 = arith.constant 0 : index
    %472 = vector.load %arg4[%c42, %c0_182] : memref<49x128xf32, #tpu.memory_space<vmem>>, vector<1x32xf32>
    %473 = vector.broadcast %472 : vector<1x32xf32> to vector<8x32xf32>
    %474 = arith.mulf %471, %473 : vector<8x32xf32>
    %c43 = arith.constant 43 : index
    %c0_183 = arith.constant 0 : index
    %475 = vector.load %arg4[%c43, %c0_183] : memref<49x128xf32, #tpu.memory_space<vmem>>, vector<1x32xf32>
    %476 = vector.broadcast %475 : vector<1x32xf32> to vector<8x32xf32>
    %477 = arith.addf %474, %476 : vector<8x32xf32>
    %c896 = arith.constant 896 : index
    %c0_184 = arith.constant 0 : index
    %478 = vector.load %arg3[%c896, %c0_184] : memref<1024x128xf32, #tpu.memory_space<vmem>>, vector<32x64xf32>
    %cst_185 = arith.constant dense<0.000000e+00> : vector<8x64xf32>
    %479 = tpu.matmul %477, %478, %cst_185 {dimension_numbers = #tpu.dot_dimension_numbers<[1], [0], [0], [1], [0, 0, 1, 1], [], []>} : vector<8x32xf32>, vector<32x64xf32>, vector<8x64xf32> -> vector<8x64xf32>
    %c38 = arith.constant 38 : index
    %c0_186 = arith.constant 0 : index
    %480 = vector.load %arg4[%c38, %c0_186] : memref<49x128xf32, #tpu.memory_space<vmem>>, vector<1x64xf32>
    %481 = vector.broadcast %480 : vector<1x64xf32> to vector<8x64xf32>
    %482 = arith.addf %479, %481 : vector<8x64xf32>
    %cst_187 = arith.constant 0.000000e+00 : f32
    %483 = vector.broadcast %cst_187 : f32 to vector<8x64xf32>
    %484 = arith.maximumf %482, %483 : vector<8x64xf32>
    %c928 = arith.constant 928 : index
    %c0_188 = arith.constant 0 : index
    %485 = vector.load %arg3[%c928, %c0_188] : memref<1024x128xf32, #tpu.memory_space<vmem>>, vector<64x32xf32>
    %cst_189 = arith.constant dense<0.000000e+00> : vector<8x32xf32>
    %486 = tpu.matmul %484, %485, %cst_189 {dimension_numbers = #tpu.dot_dimension_numbers<[1], [0], [0], [1], [0, 0, 1, 1], [], []>} : vector<8x64xf32>, vector<64x32xf32>, vector<8x32xf32> -> vector<8x32xf32>
    %c39 = arith.constant 39 : index
    %c0_190 = arith.constant 0 : index
    %487 = vector.load %arg4[%c39, %c0_190] : memref<49x128xf32, #tpu.memory_space<vmem>>, vector<1x32xf32>
    %488 = vector.broadcast %487 : vector<1x32xf32> to vector<8x32xf32>
    %489 = arith.addf %486, %488 : vector<8x32xf32>
    %490 = arith.addf %477, %489 : vector<8x32xf32>
    %cst_191 = arith.constant dense<0.000000e+00> : vector<8xf32>
    %491 = vector.multi_reduction <add>, %490, %cst_191 [1] : vector<8x32xf32> to vector<8xf32>
    %492 = vector.shape_cast %491 : vector<8xf32> to vector<8x1xf32>
    %cst_192 = arith.constant 3.200000e+01 : f32
    %493 = vector.broadcast %cst_192 : f32 to vector<8x1xf32>
    %494 = arith.divf %492, %493 : vector<8x1xf32>
    %495 = vector.broadcast %494 : vector<8x1xf32> to vector<8x32xf32>
    %496 = arith.subf %490, %495 : vector<8x32xf32>
    %497 = arith.mulf %496, %496 : vector<8x32xf32>
    %cst_193 = arith.constant dense<0.000000e+00> : vector<8xf32>
    %498 = vector.multi_reduction <add>, %497, %cst_193 [1] : vector<8x32xf32> to vector<8xf32>
    %499 = vector.shape_cast %498 : vector<8xf32> to vector<8x1xf32>
    %cst_194 = arith.constant 3.200000e+01 : f32
    %500 = vector.broadcast %cst_194 : f32 to vector<8x1xf32>
    %501 = arith.divf %499, %500 : vector<8x1xf32>
    %cst_195 = arith.constant 9.99999974E-6 : f32
    %502 = vector.broadcast %cst_195 : f32 to vector<8x1xf32>
    %503 = arith.addf %501, %502 : vector<8x1xf32>
    %504 = math.rsqrt %503 : vector<8x1xf32>
    %505 = vector.broadcast %504 : vector<8x1xf32> to vector<8x32xf32>
    %506 = arith.mulf %496, %505 : vector<8x32xf32>
    %c44 = arith.constant 44 : index
    %c0_196 = arith.constant 0 : index
    %507 = vector.load %arg4[%c44, %c0_196] : memref<49x128xf32, #tpu.memory_space<vmem>>, vector<1x32xf32>
    %508 = vector.broadcast %507 : vector<1x32xf32> to vector<8x32xf32>
    %509 = arith.mulf %506, %508 : vector<8x32xf32>
    %c45 = arith.constant 45 : index
    %c0_197 = arith.constant 0 : index
    %510 = vector.load %arg4[%c45, %c0_197] : memref<49x128xf32, #tpu.memory_space<vmem>>, vector<1x32xf32>
    %511 = vector.broadcast %510 : vector<1x32xf32> to vector<8x32xf32>
    %512 = arith.addf %509, %511 : vector<8x32xf32>
    %cst_198 = arith.constant dense<0.000000e+00> : vector<8xf32>
    %513 = vector.multi_reduction <add>, %512, %cst_198 [1] : vector<8x32xf32> to vector<8xf32>
    %514 = vector.shape_cast %513 : vector<8xf32> to vector<8x1xf32>
    %cst_199 = arith.constant 3.200000e+01 : f32
    %515 = vector.broadcast %cst_199 : f32 to vector<8x1xf32>
    %516 = arith.divf %514, %515 : vector<8x1xf32>
    %517 = vector.broadcast %516 : vector<8x1xf32> to vector<8x32xf32>
    %518 = arith.subf %512, %517 : vector<8x32xf32>
    %519 = arith.mulf %518, %518 : vector<8x32xf32>
    %cst_200 = arith.constant dense<0.000000e+00> : vector<8xf32>
    %520 = vector.multi_reduction <add>, %519, %cst_200 [1] : vector<8x32xf32> to vector<8xf32>
    %521 = vector.shape_cast %520 : vector<8xf32> to vector<8x1xf32>
    %cst_201 = arith.constant 3.200000e+01 : f32
    %522 = vector.broadcast %cst_201 : f32 to vector<8x1xf32>
    %523 = arith.divf %521, %522 : vector<8x1xf32>
    %cst_202 = arith.constant 9.99999974E-6 : f32
    %524 = vector.broadcast %cst_202 : f32 to vector<8x1xf32>
    %525 = arith.addf %523, %524 : vector<8x1xf32>
    %526 = math.rsqrt %525 : vector<8x1xf32>
    %527 = vector.broadcast %526 : vector<8x1xf32> to vector<8x32xf32>
    %528 = arith.mulf %518, %527 : vector<8x32xf32>
    %c46 = arith.constant 46 : index
    %c0_203 = arith.constant 0 : index
    %529 = vector.load %arg4[%c46, %c0_203] : memref<49x128xf32, #tpu.memory_space<vmem>>, vector<1x32xf32>
    %530 = vector.broadcast %529 : vector<1x32xf32> to vector<8x32xf32>
    %531 = arith.mulf %528, %530 : vector<8x32xf32>
    %c47 = arith.constant 47 : index
    %c0_204 = arith.constant 0 : index
    %532 = vector.load %arg4[%c47, %c0_204] : memref<49x128xf32, #tpu.memory_space<vmem>>, vector<1x32xf32>
    %533 = vector.broadcast %532 : vector<1x32xf32> to vector<8x32xf32>
    %534 = arith.addf %531, %533 : vector<8x32xf32>
    %c992 = arith.constant 992 : index
    %c0_205 = arith.constant 0 : index
    %535 = vector.load %arg3[%c992, %c0_205] : memref<1024x128xf32, #tpu.memory_space<vmem>>, vector<32x4xf32>
    %cst_206 = arith.constant dense<0.000000e+00> : vector<8x4xf32>
    %536 = tpu.matmul %534, %535, %cst_206 {dimension_numbers = #tpu.dot_dimension_numbers<[1], [0], [0], [1], [0, 0, 1, 1], [], []>} : vector<8x32xf32>, vector<32x4xf32>, vector<8x4xf32> -> vector<8x4xf32>
    %c48 = arith.constant 48 : index
    %c0_207 = arith.constant 0 : index
    %537 = vector.load %arg4[%c48, %c0_207] : memref<49x128xf32, #tpu.memory_space<vmem>>, vector<1x4xf32>
    %538 = vector.broadcast %537 : vector<1x4xf32> to vector<8x4xf32>
    %539 = arith.addf %536, %538 : vector<8x4xf32>
    %c0_208 = arith.constant 0 : index
    %c0_209 = arith.constant 0 : index
    %540 = vector.load %arg5[%c0_208, %c0_209] : memref<8x4xf32, #tpu.memory_space<vmem>>, vector<8x4xf32>
    tpu.vector_store %arg5[%c0_208, %c0_209], %539 {strides = array<i32>} : memref<8x4xf32, #tpu.memory_space<vmem>>, vector<8x4xf32>,
    return
  }
  func.func @transform_0(%arg0: i32) -> (i32, i32) {
    %c0_i32 = arith.constant 0 : i32
    %c0_i32_0 = arith.constant 0 : i32
    return %arg0, %c0_i32 : i32, i32
  }
  func.func @transform_1(%arg0: i32) -> (i32, i32) {
    %c0_i32 = arith.constant 0 : i32
    %c0_i32_0 = arith.constant 0 : i32
    return %arg0, %c0_i32 : i32, i32
  }
  func.func @transform_2(%arg0: i32) -> (i32, i32) {
    %c0_i32 = arith.constant 0 : i32
    %c0_i32_0 = arith.constant 0 : i32
    %c0_i32_1 = arith.constant 0 : i32
    return %c0_i32, %c0_i32_0 : i32, i32
  }
  func.func @transform_3(%arg0: i32) -> (i32, i32) {
    %c0_i32 = arith.constant 0 : i32
    %c0_i32_0 = arith.constant 0 : i32
    %c0_i32_1 = arith.constant 0 : i32
    return %c0_i32, %c0_i32_0 : i32, i32
  }
  func.func @transform_4(%arg0: i32) -> (i32, i32) {
    %c0_i32 = arith.constant 0 : i32
    %c0_i32_0 = arith.constant 0 : i32
    return %arg0, %c0_i32 : i32, i32
  }
}

</mosaic_0001>

<bundles_post_ra>
// kernel: forward.1
= control target key start
LH: loop header
LB: loop body
LE: loop exit
PB: predicated region body
PF: predicated region fallthrough
CT: control target
= control target key end

     0   :  { %9 = vsyncpa [#allocation3], 0  ;;  %s5499_s15 = smov 0   ;;  %s6059_s0 = inlined_call_operand.vmem [shape: f32[16,128], index: 0, kind: input, shape index: {}]   ;;  %s6060_s1 = inlined_call_operand.vmem [shape: f32[16,128], index: 1, kind: input, shape index: {}]   ;;  %s6061_s2 = inlined_call_operand.hbm [shape: f32[1024,128], index: 2, kind: input, shape index: {}]   ;;  %s6062_s3 = inlined_call_operand.vmem [shape: f32[49,128], index: 3, kind: input, shape index: {}]   ;;  %s6063_s4 = inlined_call_operand.vmem [shape: f32[16,4], index: 4, kind: output, shape index: {}]  }
   0x1 LB: > { %s5505_s16 = sadd.s32 4294967295, %s5466_s15   ;;  %p4372_p0 = scmp.ge.s32.totalorder %s5466_s15, 1  ;;  %s5466_s15 = sphi %s5499_s15, %s15_s15  }
   0x2   : > { %p140_p1 = scmp.lt.s32.totalorder %s5466_s15, 3  ;;  %s5468_s17 = smov [#allocation2]  }
   0x3   : > { %s152_s18 = sshll.u32 %s5468_s17, 4  ;;  %p6064_p3 = scmp.eq.s32.totalorder %s5505_s16, 0  ;;  %s153_s18 = int_to_ptr.vmem [resolvable:$true] %s152_s18 }
   0x4   : > { %p5509_p2 = pnand %p4372_p0, %p140_p1  ;;  %s5428_s23 = scalar_lea.hbm %s6061_s2, 16384 }
   0x5   : > { %p5429_p6 = scmp.ne.s32.totalorder %s6061_s2, %s5428_s23  ;;  %p5435_p10 = scmp.lt.u32.totalorder %s5428_s23, %s6061_s2 }
   0x6   : > { %s6066_s19 = scalar_select %p5509_p2, 1, 0 }
   0x7   : > { %p5338_p4 = pneg %p5509_p2 }
   0x9   : > { %p5518_p5 = pnand %p6064_p3, %p5338_p4 }
   0xb   : > { %p5430_p7 = pneg %p5518_p5 }
   0xd   : > { %p5431_p8 = pnand %p5430_p7, %p5429_p6 }
   0xf   : > { %p5432_p9 = pneg %p5431_p8 }
  0x11   : > { %p5437_p11 = pnand %p5435_p10, %p5432_p9 }
  0x13   : > { %5440 = shalt.err (!%p5437_p11)
}
  0x14   : > { %s5441_s28 = scalar_lea.vmem %s153_s18, 16384  ;;  %p5449_p1 = scmp.lt.s32.totalorder %s153_s18, %s153_s18 }
  0x15   : > { %p5442_p12 = scmp.ne.s32.totalorder %s153_s18, %s5441_s28  ;;  %p5450_p4 = scmp.lt.s32.totalorder %s5441_s28, %s5441_s28 }
  0x17   : > { %p5444_p13 = pnand %p5442_p12, %p5430_p7  ;;  %p5451_p3 = por %p5450_p4, %p5449_p1 }
  0x19   : > { %p5445_p0 = pneg %p5444_p13 }
  0x1b   : > { %p5452_p2 = pnand %p5451_p3, %p5445_p0 }
  0x1d   : > { %5455 = shalt.err (!%p5452_p2)
}
  0x1e   : > { %s5469_s29 = smov 128   ;;  %s5470_s30 = smov 8  }
  0x1f   : > { %5341 = dma.hbm_to_vmem [thread:$0]  (!%p5518_p5), %s6061_s2, 16384, %s153_s18, [#allocation3], %s5469_s29, %s5469_s29, %s5470_s30  }
  0x20   : > { %p6068_p6 = scmp.ne.s32.totalorder %s6066_s19, 0 }
  0x21   : > { %p6069_p8 = scmp.eq.s32.totalorder (!%p6068_p6), %s5505_s16, 0 }
  0x22   : > { %185 = sbr.rel (%p6068_p6) target bundleno = 7840 (0x1ea0), region = 36 }
  0x29   : > { %5461 = dma.done.wait (%p6069_p8), [#allocation3], 16384   ;;  %p6070_p7 = pmov %p6069_p8 }
  0x2a   : > { %v5471_v0 = vmov 0.0|0.0   ;;  %vm5472_vm0 = vmmov 0   ;;  %v5473_v1 = vmov 0.0   ;;  %v226_v2 = vld [vmem:[#allocation2] sm:$0xff]  ;;  %v227_v3 = vld [vmem:[#allocation2 + $0x8] sm:$0xff]  ;;  %v228_v4 = vld [vmem:[#allocation2 + $0x10] sm:$0xff] }
  0x2b   : > { %5463 = vsyncadd (%p6070_p7), [#allocation3], 4294950912  ;;  %5124 = vmatprep.subr.bf16.mxu0 %v5471_v0  ;;  %4711 = vmatprep.mubr.msk.f32.mxu0 %vm5472_vm0, %v5473_v1  ;;  %v5125_v5 = vpack.c.bf16 %v227_v3, %v226_v2  ;;  %v229_v6 = vld [vmem:[#allocation2 + $0x18] sm:$0xff]  ;;  %v230_v8 = vld [vmem:[#allocation2 + $0x20] sm:$0xff]  ;;  %p213_p2 = scmp.lt.s32.totalorder %s5505_s16, 1  ;;  %vm321_vm1 = vcmask 261120  }
  0x2c   : > { %5148 = vmatprep.subr.bf16.mxu1 %v5471_v0  ;;  %4722 = vmatprep.mubr.msk.f32.mxu1 %vm5472_vm0, %v5473_v1  ;;  %v5128_v7 = vpack.c.bf16 %v229_v6, %v228_v4  ;;  %v231_v9 = vld [vmem:[#allocation2 + $0x28] sm:$0xff]  ;;  %v312_v10 = vld [vmem:[#allocation2 + $0x100] sm:$0xff]  ;;  %v314_v12 = vld [vmem:[#allocation2 + $0x110] sm:$0xff]  ;;  %vm600_vm2 = vcmask 523264   ;;  %vm1013_vm3 = vcmask 64512   ;;  %vm4291_vm4 = vcmask 31744  }
  0x2d   : > { %5126 = vmatpush3.bf16.msra.mxu0 %v5125_v5  ;;  %v313_v11 = vld [vmem:[#allocation2 + $0x108] sm:$0xff]  ;;  %v315_v13 = vld [vmem:[#allocation2 + $0x118] sm:$0xff]  ;;  %v5131_v14 = vpack.c.bf16 %v231_v9, %v230_v8  ;;  %v232_v16 = vld [vmem:[#allocation2 + $0x30] sm:$0xff]  ;;  %s6072_s16 = smov (!%p213_p2, %s5505_s16), 1 }
  0x2e   : > { %5127 = vmatprep.subr.bf16.mxu0 %v5471_v0  ;;  %v5149_v15 = vpack.c.bf16 %v313_v11, %v312_v10  ;;  %v233_v17 = vld [vmem:[#allocation2 + $0x38] sm:$0xff]  ;;  %v5152_v18 = vpack.c.bf16 %v315_v13, %v314_v12  ;;  %v234_v20 = vld [vmem:[#allocation2 + $0x40] sm:$0xff]  ;;  %v235_v21 = vld [vmem:[#allocation2 + $0x48] sm:$0xff]  ;;  %s5560_s7 = sshll.u32 %s6072_s16, 3 }
  0x2f   : > { %v5134_v19 = vpack.c.bf16 %v233_v17, %v232_v16  ;;  %v5137_v22 = vpack.c.bf16 %v235_v21, %v234_v20  ;;  %v236_v23 = vld [vmem:[#allocation2 + $0x50] sm:$0xff]  ;;  %v237_v24 = vld [vmem:[#allocation2 + $0x58] sm:$0xff]  ;;  %v238_v26 = vld [vmem:[#allocation2 + $0x60] sm:$0xff]  ;;  %s216_s10 = scalar_lea.vmem %s6059_s0, %s5560_s7  ;;  %s220_s22 = scalar_lea.vmem %s6060_s1, %s5560_s7 }
  0x30   : > { %5150 = vmatpush3.bf16.msra.mxu1 %v5149_v15  ;;  %v5140_v25 = vpack.c.bf16 %v237_v24, %v236_v23  ;;  %v239_v27 = vld [vmem:[#allocation2 + $0x68] sm:$0xff]  ;;  %v240_v29 = vld [vmem:[#allocation2 + $0x70] sm:$0xff]  ;;  %v241_v30 = vld [vmem:[#allocation2 + $0x78] sm:$0xff]  ;;  %s224_s12 = scalar_lea.vmem %s6063_s4, %s5560_s7 }
  0x31   : > { %5129 = vmatpush3.bf16.msra.mxu0 %v5128_v7  ;;  %5151 = vmatprep.subr.bf16.mxu1 %v5471_v0  ;;  %v5143_v28 = vpack.c.bf16 %v239_v27, %v238_v26  ;;  %v5146_v31 = vpack.c.bf16 %v241_v30, %v240_v29  ;;  %v225_v32 = vld [vmem:[%s216_s10] sm:$0xff]  ;;  %v396_v34 = vld [vmem:[#allocation2 + $0x128] sm:$0xff]  ;;  %v397_v38 = vld [vmem:[#allocation2 + $0x130] sm:$0xff] }
  0x32   : > { %5130 = vmatprep.subr.bf16.mxu0 %v5471_v0  ;;  %v395_v33 = vld [vmem:[#allocation2 + $0x120] sm:$0xff]  ;;  %v398_v39 = vld [vmem:[#allocation2 + $0x138] sm:$0xff]  ;;  %v4380_v41 = vld [vmem:[%s6062_s3 + $0xc] ss:$0 sm:$0xff] }
  0x33   : > { %v5155_v35 = vpack.c.bf16 %v396_v34, %v395_v33  ;;  %v5158_v40 = vpack.c.bf16 %v398_v39, %v397_v38  ;;  %v4382_v45 = vld [vmem:[%s6062_s3 + $0xd] ss:$0 sm:$0xff]  ;;  %v504_v56 = vld [vmem:[#allocation2 + $0x140] sm:$0xff]  ;;  %v506_v59 = vld [vmem:[#allocation2 + $0x150] sm:$0xff] }
  0x34   : > { %5153 = vmatpush3.bf16.msra.mxu1 %v5152_v18  ;;  %v505_v57 = vld [vmem:[#allocation2 + $0x148] sm:$0xff]  ;;  %v507_v60 = vld [vmem:[#allocation2 + $0x158] sm:$0xff]  ;;  %v587_v6 = vld [vmem:[#allocation2 + $0x160] sm:$0xff] }
  0x35   : > { %5132 = vmatpush3.bf16.msra.mxu0 %v5131_v14  ;;  %5154 = vmatprep.subr.bf16.mxu1 %v5471_v0  ;;  %v5161_v58 = vpack.c.bf16 %v505_v57, %v504_v56  ;;  %v5164_v61 = vpack.c.bf16 %v507_v60, %v506_v59  ;;  %v5591_v4 = vld [vmem:[%s6062_s3 + $0xe] ss:$0 sm:$0xff]  ;;  %v5596_v8 = vld [vmem:[%s6062_s3 + $0xf] ss:$0 sm:$0xff]  ;;  %v589_v12 = vld [vmem:[#allocation2 + $0x170] sm:$0xff] }
  0x36   : > { %5133 = vmatprep.subr.bf16.mxu0 %v5471_v0  ;;  %v588_v7 = vld [vmem:[#allocation2 + $0x168] sm:$0xff]  ;;  %v590_v13 = vld [vmem:[#allocation2 + $0x178] sm:$0xff]  ;;  %v591_v15 = vld [vmem:[#allocation2 + $0x180] sm:$0xff] }
  0x37   : > { %v5167_v10 = vpack.c.bf16 %v588_v7, %v587_v6  ;;  %v5170_v14 = vpack.c.bf16 %v590_v13, %v589_v12  ;;  %v592_v16 = vld [vmem:[#allocation2 + $0x188] sm:$0xff]  ;;  %v593_v18 = vld [vmem:[#allocation2 + $0x190] sm:$0xff]  ;;  %v775_v60 = vld [vmem:[#allocation2 + $0x1d8] sm:$0xff] }
  0x38   : > { %v5173_v17 = vpack.c.bf16 %v592_v16, %v591_v15  ;;  %v4386_v21 = vld [vmem:[%s6062_s3 + $0x10] ss:$0 sm:$0xff]  ;;  %v4388_v26 = vld [vmem:[%s6062_s3 + $0x11] ss:$0 sm:$0xff]  ;;  %v691_v38 = vld [vmem:[#allocation2 + $0x1a8] sm:$0xff] }
  0x39   : > { %5135 = vmatpush3.bf16.msra.mxu0 %v5134_v19  ;;  %v594_v19 = vld [vmem:[#allocation2 + $0x198] sm:$0xff]  ;;  %v774_v59 = vld [vmem:[#allocation2 + $0x1d0] sm:$0xff]  ;;  %v5668_v16 = vld [vmem:[%s6062_s3 + $0xa] ss:$0 sm:$0xff] }
  0x3a   : > { %5136 = vmatprep.subr.bf16.mxu0 %v5471_v0  ;;  %v5176_v20 = vpack.c.bf16 %v594_v19, %v593_v18  ;;  %v5681_v19 = vld [vmem:[%s6062_s3 + $0xb] ss:$0 sm:$0xff] }
  0x3d   : > { %5138 = vmatpush3.bf16.msra.mxu0 %v5137_v22 }
  0x3e   : > { %5139 = vmatprep.subr.bf16.mxu0 %v5471_v0 }
  0x41   : > { %5141 = vmatpush3.bf16.msra.mxu0 %v5140_v25 }
  0x42   : > { %5142 = vmatprep.subr.bf16.mxu0 %v5471_v0 }
  0x45   : > { %5144 = vmatpush3.bf16.msra.mxu0 %v5143_v28 }
  0x46   : > { %5145 = vmatprep.subr.bf16.mxu0 %v5471_v0 }
  0x49   : > { %5147 = vmatpush3.bf16.msra.mxu0 %v5146_v31 }
  0x4a   : > { %5178 = vmatprep.subr.bf16.mxu0 %v5471_v0 }
  0x4c   : > { %4712 = vmatmul.mubr.f32.vlgmr.msra.gmra.mrb[0].mxu0 %v225_v32 }
  0x4d   : > { %4774 = vmatprep.mubr.msk.f32.mxu0 %vm5472_vm0, %v5473_v1 }
 0x11f   : > { %v308_v36 = vpop.f32.mrb[0].mxu0 }
 0x120   : > { %v4713_v37 = vpop.f32.mrb[1].mxu0  ;;  %4723 = vmatmul.mubr.msk.f32.vlgmr.msra.gmra.mrb[0].mxu1 %vm321_vm1, %v308_v36 }
 0x121   : > { %5156 = vmatpush3.bf16.msra.mxu1 %v5155_v35  ;;  %4733 = vmatprep.mubr.msk.f32.mxu1 %vm5472_vm0, %v5473_v1  ;;  %v690_v37 = vld [vmem:[#allocation2 + $0x1a0] sm:$0xff] }
 0x122   : > { %5157 = vmatprep.subr.bf16.mxu1 %v5471_v0  ;;  %v5179_v39 = vpack.c.bf16 %v691_v38, %v690_v37 }
 0x124   : > { %5180 = vmatpush3.bf16.msra.mxu0 %v5179_v39 }
 0x125   : > { %5159 = vmatpush3.bf16.msra.mxu1 %v5158_v40  ;;  %v851_v40 = vld [vmem:[#allocation2 + $0x1e0] sm:$0xff]  ;;  %5181 = vmatprep.subr.bf16.mxu0 %v5471_v0 }
 0x126   : > { %5160 = vmatprep.subr.bf16.mxu1 %v5471_v0 }
 0x1f3   : > { %v391_v42 = vpop.f32.mrb[0].mxu1 }
 0x1f4   : > { %v392_v43 = vadd.f32 %v4380_v41, %v391_v42  ;;  %v4724_v44 = vpop.f32.mrb[1].mxu1  ;;  %v852_v41 = vld [vmem:[#allocation2 + $0x1e8] sm:$0xff] }
 0x1f5   : > { %v5191_v42 = vpack.c.bf16 %v852_v41, %v851_v40  ;;  %v693_v44 = vld [vmem:[#allocation2 + $0x1b8] sm:$0xff] }
 0x1f6   : > { %4734 = vmatmul.mubr.msk.f32.vlgmr.msra.gmra.mrb[2].mxu1 %vm321_vm1, %v392_v43  ;;  %v692_v43 = vld [vmem:[#allocation2 + $0x1b0] sm:$0xff] }
 0x1f7   : > { %4744 = vmatprep.mubr.msk.f32.mxu1 %vm5472_vm0, %v5473_v1  ;;  %5162 = vmatpush3.bf16.msra.mxu1 %v5161_v58 }
 0x1f8   : > { %5163 = vmatprep.subr.bf16.mxu1 %v5471_v0 }
 0x1fb   : > { %5165 = vmatpush3.bf16.msra.mxu1 %v5164_v61  ;;  %v5188_v61 = vpack.c.bf16 %v775_v60, %v774_v59 }
 0x1fc   : > { %5166 = vmatprep.subr.bf16.mxu1 %v5471_v0 }
 0x2c9   : > { %v473_v46 = vpop.f32.mrb[2].mxu1 }
 0x2ca   : > { %v474_v47 = vadd.f32 %v4382_v45, %v473_v46  ;;  %v4735_v48 = vpop.f32.mrb[3].mxu1  ;;  %v5182_v45 = vpack.c.bf16 %v693_v44, %v692_v43  ;;  %v853_v46 = vld [vmem:[#allocation2 + $0x1f0] sm:$0xff] }
 0x2cc   : > { %v477_v49 = vadd.f32 %v474_v47, %v308_v36  ;;  %v854_v47 = vld [vmem:[#allocation2 + $0x1f8] sm:$0xff]  ;;  %5183 = vmatpush3.bf16.msra.mxu0 %v5182_v45 }
 0x2cd   : > { %v5194_v48 = vpack.c.bf16 %v854_v47, %v853_v46  ;;  %5184 = vmatprep.subr.bf16.mxu0 %v5471_v0 }
 0x2ce   : > { %v478_v50 = vsel %vm321_vm1, %v477_v49, 0.0 }
 0x2cf   : > { %479 = vadd.xlane.f32.xlu0 %v478_v50 }
 0x35c   : > { %v480_v51 = vpop.xlane.xlu0 %479 }
 0x35d   : > { %v482_v52 = vmul.f32 0.03125, %v480_v51 }
 0x35f   : > { %v483_v53 = vsub.f32 %v477_v49, %v482_v52 }
 0x361   : > { %v484_v54 = vmul.f32 %v483_v53, %v483_v53 }
 0x363   : > { %v485_v55 = vsel %vm321_vm1, %v484_v54, 0.0  ;;  %v772_v54 = vld [vmem:[#allocation2 + $0x1c0] sm:$0xff] }
 0x364   : > { %486 = vadd.xlane.f32.xlu0 %v485_v55  ;;  %v773_v55 = vld [vmem:[#allocation2 + $0x1c8] sm:$0xff] }
 0x365   : > { %v5185_v57 = vpack.c.bf16 %v773_v55, %v772_v54  ;;  %v1593_v54 = vld [vmem:[#allocation2 + $0x208] sm:$0xff]  ;;  %v1594_v55 = vld [vmem:[#allocation2 + $0x210] sm:$0xff] }
 0x3f1   : > { %v487_v62 = vpop.xlane.xlu0 %486 }
 0x3f2   : > { %v488_v63 = vmul.f32 0.03125, %v487_v62 }
 0x3f4   : > { %v489_v2 = vadd.f32 1e-05, %v488_v63 }
 0x3f6   : > { %5358 = vrsqrt.f32 %v489_v2 }
 0x400   : > { %v5359_v3 = vpop.eup %5358 }
 0x401   : > { %v491_v5 = vmul.f32 %v5359_v3, %v483_v53 }
 0x403   : > { %v497_v9 = vmul.f32 %v5591_v4, %v491_v5  ;;  %v4394_v5 = vld [vmem:[%s6062_s3 + $0x14] ss:$0 sm:$0xff] }
 0x405   : > { %v503_v11 = vadd.f32 %v5596_v8, %v497_v9  ;;  %v5649_v9 = vld [vmem:[%s6062_s3 + $0x8] ss:$0 sm:$0xff] }
 0x407   : > { %4745 = vmatmul.mubr.msk.f32.vlgmr.msra.gmra.mrb[4].mxu1 %vm321_vm1, %v503_v11 }
 0x408   : > { %5168 = vmatpush3.bf16.msra.mxu1 %v5167_v10  ;;  %4763 = vmatprep.mubr.msk.f32.mxu1 %vm5472_vm0, %v5473_v1  ;;  %v5654_v10 = vld [vmem:[%s6062_s3 + $0x9] ss:$0 sm:$0xff] }
 0x409   : > { %5169 = vmatprep.subr.bf16.mxu1 %v5471_v0 }
 0x40c   : > { %5171 = vmatpush3.bf16.msra.mxu1 %v5170_v14 }
 0x40d   : > { %5172 = vmatprep.subr.bf16.mxu1 %v5471_v0 }
 0x410   : > { %5174 = vmatpush3.bf16.msra.mxu1 %v5173_v17 }
 0x411   : > { %5175 = vmatprep.subr.bf16.mxu1 %v5471_v0 }
 0x414   : > { %5177 = vmatpush3.bf16.msra.mxu1 %v5176_v20 }
 0x415   : > { %5190 = vmatprep.subr.bf16.mxu1 %v5471_v0 }
 0x4da   : > { %v582_v22 = vpop.f32.mrb[4].mxu1 }
 0x4db   : > { %v583_v23 = vadd.f32 %v4386_v21, %v582_v22  ;;  %v4746_v24 = vpop.f32.mrb[5].mxu1 }
 0x4dd   : > { %v586_v25 = vmax.f32 %v583_v23, 0.0 }
 0x4df   : > { %4764 = vmatmul.mubr.msk.f32.vlgmr.msra.gmra.mrb[6].mxu1 %vm600_vm2, %v586_v25 }
 0x4e0   : > { %4796 = vmatprep.mubr.msk.f32.mxu1 %vm5472_vm0, %v5473_v1  ;;  %5192 = vmatpush3.bf16.msra.mxu1 %v5191_v42 }
 0x4e1   : > { %5193 = vmatprep.subr.bf16.mxu1 %v5471_v0 }
 0x4e4   : > { %5195 = vmatpush3.bf16.msra.mxu1 %v5194_v48 }
 0x4e5   : > { %4804 = vmatprep.subr.mxu1 %v5473_v1 }
 0x5b2   : > { %v670_v27 = vpop.f32.mrb[6].mxu1 }
 0x5b3   : > { %v671_v28 = vadd.f32 %v4388_v26, %v670_v27  ;;  %v4765_v29 = vpop.f32.mrb[7].mxu1 }
 0x5b5   : > { %v674_v30 = vadd.f32 %v671_v28, %v503_v11  ;;  %v4390_v11 = vld [vmem:[%s6062_s3 + $0x12] ss:$0 sm:$0xff] }
 0x5b7   : > { %v675_v31 = vsel %vm321_vm1, %v674_v30, 0.0 }
 0x5b8   : > { %676 = vadd.xlane.f32.xlu1 %v675_v31 }
 0x645   : > { %v677_v32 = vpop.xlane.xlu1 %676 }
 0x646   : > { %v678_v33 = vmul.f32 0.03125, %v677_v32 }
 0x648   : > { %v679_v34 = vsub.f32 %v674_v30, %v678_v33 }
 0x64a   : > { %v680_v35 = vmul.f32 %v679_v34, %v679_v34 }
 0x64c   : > { %v681_v36 = vsel %vm321_vm1, %v680_v35, 0.0 }
 0x64d   : > { %682 = vadd.xlane.f32.xlu1 %v681_v36 }
 0x6da   : > { %v683_v49 = vpop.xlane.xlu1 %682 }
 0x6db   : > { %v684_v50 = vmul.f32 0.03125, %v683_v49 }
 0x6dd   : > { %v685_v51 = vadd.f32 1e-05, %v684_v50 }
 0x6df   : > { %5360 = vrsqrt.f32 %v685_v51 }
 0x6e9   : > { %v5361_v52 = vpop.eup %5360 }
 0x6ea   : > { %v687_v53 = vmul.f32 %v5361_v52, %v679_v34 }
 0x6ec   : > { %v688_v56 = vmul.f32 %v5591_v4, %v687_v53  ;;  %v4392_v4 = vld [vmem:[%s6062_s3 + $0x13] ss:$0 sm:$0xff]  ;;  %v1592_v53 = vld [vmem:[#allocation2 + $0x200] sm:$0xff] }
 0x6ee   : > { %v5624_v58 = vadd.f32 %v5596_v8, %v688_v56  ;;  %v5197_v56 = vpack.c.bf16 %v1593_v54, %v1592_v53 }
 0x6f0   : > { %4775 = vmatmul.mubr.msk.f32.vlgmr.msra.gmra.mrb[2].mxu0 %vm321_vm1, %v5624_v58  ;;  %4797 = vmatmul.mubr.msk.f32.vlgmr.msra.gmra.mrb[8].mxu1 %vm321_vm1, %v5624_v58 }
 0x6f1   : > { %5186 = vmatpush3.bf16.msra.mxu0 %v5185_v57  ;;  %4785 = vmatprep.mubr.msk.f32.mxu0 %vm5472_vm0, %v5473_v1  ;;  %v1595_v57 = vld [vmem:[#allocation2 + $0x218] sm:$0xff] }
 0x6f2   : > { %5187 = vmatprep.subr.bf16.mxu0 %v5471_v0  ;;  %4806 = vmatprep.mubr.msk.f32.mxu1 %vm5472_vm0, %v5473_v1  ;;  %v5200_v59 = vpack.c.bf16 %v1595_v57, %v1594_v55  ;;  %v1924_v57 = vld [vmem:[#allocation2 + $0x98] sm:$0xff] }
 0x6f5   : > { %5189 = vmatpush3.bf16.msra.mxu0 %v5188_v61 }
 0x6f6   : > { %4799 = vmatprep.subr.mxu0 %v5473_v1 }
 0x6f8   : > { %4786 = vmatmul.mubr.msk.f32.vlgmr.msra.gmra.mrb[4].mxu0 %vm321_vm1, %v5624_v58 }
 0x6f9   : > { %4801 = vmatprep.mubr.msk.f32.mxu0 %vm5472_vm0, %v5473_v1 }
 0x7c3   : > { %v768_v62 = vpop.f32.mrb[2].mxu0  ;;  %v926_v63 = vpop.f32.mrb[8].mxu1 }
 0x7c4   : > { %v4776_v2 = vpop.f32.mrb[3].mxu0  ;;  %v4798_v3 = vpop.f32.mrb[9].mxu1  ;;  %v5659_v12 = vadd.f32 %v4394_v5, %v926_v63  ;;  %v769_v15 = vadd.f32 %v4390_v11, %v768_v62 }
 0x7c6   : > { %v1031_v18 = vmul.f32 %v5654_v10, %v5659_v12  ;;  %v936_v3 = vmul.f32 %v5649_v9, %v5659_v12 }
 0x7cb   : > { %v847_v6 = vpop.f32.mrb[4].mxu0 }
 0x7cc   : > { %v848_v7 = vadd.f32 %v4392_v4, %v847_v6  ;;  %v4787_v8 = vpop.f32.mrb[5].mxu0 }
 0x7ce   : > { %v935_v13 = vmul.f32 %v5649_v9, %v848_v7  ;;  %v1030_v14 = vmul.f32 %v5654_v10, %v848_v7  ;;  %v1267_v17 = vmul.f32 %v5668_v16, %v848_v7  ;;  %v1432_v20 = vmul.f32 %v5681_v19, %v848_v7 }
 0x7cf   : > { %v1268_v7 = vmul.f32 %v5668_v16, %v5659_v12 }
 0x7d0   : > { %4800 = vmatpush3.xpose.msk.msra.mxu0 %vm321_vm1, %v935_v13  ;;  %4805 = vmatpush3.xpose.msk.msra.mxu1 %vm321_vm1, %v1030_v14  ;;  %v1433_v13 = vmul.f32 %v5681_v19, %v5659_v12  ;;  %v4412_v12 = vld [vmem:[%s6062_s3 + $0x15] ss:$0 sm:$0xff] }
 0x7d1   : > { %4809 = vmatprep.subr.mxu0 %v5473_v1  ;;  %4819 = vmatprep.subr.mxu1 %v5473_v1 }
 0x7d3   : > { %4802 = vmatmul.mubr.msk.f32.vlgmr.msra.gmra.mrb[6].mxu0 %vm321_vm1, %v769_v15  ;;  %4807 = vmatmul.mubr.msk.f32.vlgmr.msra.gmra.mrb[10].mxu1 %vm321_vm1, %v769_v15 }
 0x7d4   : > { %4810 = vmatpush3.msra.mxu0 %v1031_v18  ;;  %4820 = vmatpush3.xpose.msk.msra.mxu1 %vm321_vm1, %v1267_v17 }
 0x7d5   : > { %4821 = vmatprep.mubr.msk.f32.mxu1 %vm5472_vm0, %v5473_v1  ;;  %4829 = vmatprep.subr.mxu1 %v5473_v1 }
 0x7d6   : > { %4811 = vmatprep.mubr.msk.f32.mxu0 %vm5472_vm0, %v5473_v1  ;;  %4814 = vmatprep.subr.mxu0 %v5473_v1 }
 0x7d7   : > { %4822 = vmatmul.mubr.msk.f32.vlgmr.msra.gmra.mrb[12].mxu1 %vm321_vm1, %v769_v15 }
 0x7d8   : > { %4830 = vmatpush3.xpose.msk.msra.mxu1 %vm321_vm1, %v1432_v20  ;;  %4831 = vmatprep.mubr.msk.f32.mxu1 %vm5472_vm0, %v5473_v1 }
 0x7d9   : > { %5196 = vmatprep.subr.bf16.mxu1 %v5471_v0 }
 0x7db   : > { %4832 = vmatmul.mubr.msk.f32.vlgmr.msra.gmra.mrb[14].mxu1 %vm321_vm1, %v769_v15 }
 0x7dc   : > { %4847 = vmatprep.mubr.msk.f32.mxu1 %vm5472_vm0, %v5473_v1  ;;  %5198 = vmatpush3.bf16.msra.mxu1 %v5197_v56  ;;  %v1923_v56 = vld [vmem:[#allocation2 + $0x90] sm:$0xff] }
 0x7dd   : > { %5199 = vmatprep.subr.bf16.mxu1 %v5471_v0 }
 0x7e0   : > { %5201 = vmatpush3.bf16.msra.mxu1 %v5200_v59  ;;  %v5224_v59 = vpack.c.bf16 %v1924_v57, %v1923_v56  ;;  %v4424_v57 = vld [vmem:[%s6062_s3 + $0x1e] ss:$0 sm:$0xff] }
 0x7e1   : > { %5208 = vmatprep.subr.bf16.mxu1 %v5471_v0 }
 0x8a6   : > { %v1009_v21 = vpop.f32.mrb[6].mxu0  ;;  %v1101_v22 = vpop.f32.mrb[10].mxu1 }
 0x8a7   : > { %v4803_v23 = vpop.f32.mrb[7].mxu0  ;;  %v4808_v24 = vpop.f32.mrb[11].mxu1  ;;  %v1105_v25 = vsel %vm1013_vm3, %v1101_v22, -inf  ;;  %v1014_v26 = vsel %vm1013_vm3, %v1009_v21, -inf }
 0x8a8   : > { %1106 = vmax.xlane.f32.xlu0 %v1105_v25  ;;  %1015 = vmax.xlane.f32.xlu1 %v1014_v26 }
 0x8aa   : > { %v1338_v27 = vpop.f32.mrb[12].mxu1 }
 0x8ab   : > { %v4823_v28 = vpop.f32.mrb[13].mxu1  ;;  %v1342_v29 = vsel %vm1013_vm3, %v1338_v27, -inf }
 0x8ac   : > { %1343 = vmax.xlane.f32.xlu0 %v1342_v29 }
 0x8ae   : > { %v1503_v30 = vpop.f32.mrb[14].mxu1 }
 0x8af   : > { %v4833_v31 = vpop.f32.mrb[15].mxu1  ;;  %v1507_v32 = vsel %vm1013_vm3, %v1503_v30, -inf }
 0x8b0   : > { %1508 = vmax.xlane.f32.xlu1 %v1507_v32  ;;  %v1701_v31 = vld [vmem:[#allocation2 + $0x228] sm:$0xff] }
 0x935   : > { %v1107_v33 = vpop.xlane.xlu0 %1106  ;;  %v1016_v34 = vpop.xlane.xlu1 %1015 }
 0x936   : > { %v1108_v35 = vsub.f32 %v1101_v22, %v1107_v33  ;;  %v1017_v36 = vsub.f32 %v1009_v21, %v1016_v34  ;;  %v1702_v33 = vld [vmem:[#allocation2 + $0x230] sm:$0xff]  ;;  %v1703_v34 = vld [vmem:[#allocation2 + $0x238] sm:$0xff] }
 0x938   : > { %v1109_v37 = vmul.f32 1.442695, %v1108_v35  ;;  %v1018_v38 = vmul.f32 1.442695, %v1017_v36  ;;  %v5206_v35 = vpack.c.bf16 %v1703_v34, %v1702_v33  ;;  %v1784_v36 = vld [vmem:[#allocation2 + $0x248] sm:$0xff]  ;;  %v2010_v33 = vld [vmem:[#allocation2 + $0x298] sm:$0xff] }
 0x939   : > { %v1344_v39 = vpop.xlane.xlu0 %1343 }
 0x93a   : > { %5362 = vpow2.f32 %v1109_v37  ;;  %v1345_v40 = vsub.f32 %v1338_v27, %v1344_v39  ;;  %v1785_v37 = vld [vmem:[#allocation2 + $0x250] sm:$0xff]  ;;  %v1786_v39 = vld [vmem:[#allocation2 + $0x258] sm:$0xff] }
 0x93b   : > { %5364 = vpow2.f32 %v1018_v38 }
 0x93c   : > { %v1346_v41 = vmul.f32 1.442695, %v1345_v40  ;;  %v5212_v40 = vpack.c.bf16 %v1786_v39, %v1785_v37  ;;  %v2091_v37 = vld [vmem:[#allocation2 + $0x2b0] sm:$0xff] }
 0x93d   : > { %v1509_v42 = vpop.xlane.xlu1 %1508 }
 0x93e   : > { %5366 = vpow2.f32 %v1346_v41  ;;  %v1510_v43 = vsub.f32 %v1503_v30, %v1509_v42  ;;  %v1700_v30 = vld [vmem:[#allocation2 + $0x220] sm:$0xff]  ;;  %v1788_v42 = vld [vmem:[#allocation2 + $0x268] sm:$0xff] }
 0x93f   : > { %v5203_v32 = vpack.c.bf16 %v1701_v31, %v1700_v30  ;;  %v1787_v41 = vld [vmem:[#allocation2 + $0x260] sm:$0xff] }
 0x940   : > { %v1511_v44 = vmul.f32 1.442695, %v1510_v43  ;;  %v5215_v43 = vpack.c.bf16 %v1788_v42, %v1787_v41  ;;  %v2168_v42 = vld [vmem:[#allocation2 + $0x2c0] sm:$0xff] }
 0x942   : > { %5368 = vpow2.f32 %v1511_v44 }
 0x944   : > { %v5363_v45 = vpop.eup %5362 }
 0x945   : > { %v5365_v46 = vpop.eup %5364  ;;  %v1111_v47 = vsel %vm1013_vm3, %v5363_v45, 0.0 }
 0x946   : > { %1112 = vadd.xlane.f32.xlu0 %v1111_v47  ;;  %v1020_v48 = vsel %vm1013_vm3, %v5365_v46, 0.0 }
 0x947   : > { %1021 = vadd.xlane.f32.xlu1 %v1020_v48  ;;  %v4414_v48 = vld [vmem:[%s6062_s3 + $0x18] ss:$0 sm:$0xff] }
 0x948   : > { %v5367_v49 = vpop.eup %5366 }
 0x949   : > { %v1348_v50 = vsel %vm1013_vm3, %v5367_v49, 0.0 }
 0x94a   : > { %1349 = vadd.xlane.f32.xlu0 %v1348_v50  ;;  %v1921_v50 = vld [vmem:[#allocation2 + $0x80] sm:$0xff] }
 0x94c   : > { %v5369_v51 = vpop.eup %5368 }
 0x94d   : > { %v1513_v52 = vsel %vm1013_vm3, %v5369_v51, 0.0 }
 0x94e   : > { %1514 = vadd.xlane.f32.xlu1 %v1513_v52  ;;  %v4415_v52 = vld [vmem:[%s6062_s3 + $0x19] ss:$0 sm:$0xff] }
 0x9d3   : > { %v1113_v60 = vpop.xlane.xlu0 %1112 }
 0x9d4   : > { %5370 = vrcp.f32 %v1113_v60  ;;  %v1022_v61 = vpop.xlane.xlu1 %1021  ;;  %v1925_v60 = vld [vmem:[#allocation2 + $0xa0] sm:$0xff] }
 0x9d5   : > { %5372 = vrcp.f32 %v1022_v61  ;;  %v1926_v61 = vld [vmem:[#allocation2 + $0xa8] sm:$0xff] }
 0x9d7   : > { %v1350_v2 = vpop.xlane.xlu0 %1349 }
 0x9d8   : > { %5374 = vrcp.f32 %v1350_v2  ;;  %v1928_v2 = vld [vmem:[#allocation2 + $0xb8] sm:$0xff] }
 0x9db   : > { %v1515_v6 = vpop.xlane.xlu1 %1514 }
 0x9dc   : > { %5376 = vrcp.f32 %v1515_v6 }
 0x9de   : > { %v5371_v62 = vpop.eup %5370 }
 0x9df   : > { %v1115_v63 = vmul.f32 %v5371_v62, %v5363_v45  ;;  %v5373_v4 = vpop.eup %5372  ;;  %v5227_v62 = vpack.c.bf16 %v1926_v61, %v1925_v60 }
 0x9e0   : > { %v1024_v5 = vmul.f32 %v5373_v4, %v5365_v46  ;;  %v1929_v4 = vld [vmem:[#allocation2 + $0xc0] sm:$0xff] }
 0x9e1   : > { %4812 = vmatmul.mubr.msk.f32.vlgmr.msra.gmra.mrb[8].mxu0 %vm1013_vm3, %v1115_v63  ;;  %v1927_v63 = vld [vmem:[#allocation2 + $0xb0] sm:$0xff] }
 0x9e2   : > { %4815 = vmatpush3.msra.mxu0 %v936_v3  ;;  %4816 = vmatprep.mubr.msk.f32.mxu0 %vm5472_vm0, %v5473_v1  ;;  %v5375_v8 = vpop.eup %5374  ;;  %v5230_v3 = vpack.c.bf16 %v1928_v2, %v1927_v63 }
 0x9e3   : > { %4824 = vmatprep.subr.mxu0 %v5473_v1  ;;  %v1352_v11 = vmul.f32 %v5375_v8, %v5367_v49  ;;  %v1932_v8 = vld [vmem:[#allocation2 + $0xd8] sm:$0xff] }
 0x9e6   : > { %v5377_v14 = vpop.eup %5376 }
 0x9e7   : > { %v1517_v15 = vmul.f32 %v5377_v14, %v5369_v51  ;;  %v1922_v51 = vld [vmem:[#allocation2 + $0x88] sm:$0xff] }
 0x9e8   : > { %v5221_v54 = vpack.c.bf16 %v1922_v51, %v1921_v50  ;;  %v1934_v14 = vld [vmem:[#allocation2 + $0xe8] sm:$0xff] }
 0x9e9   : > { %4817 = vmatmul.mubr.msk.f32.vlgmr.msra.gmra.mrb[8].mxu0 %vm1013_vm3, %v1024_v5  ;;  %v1930_v5 = vld [vmem:[#allocation2 + $0xc8] sm:$0xff] }
 0x9ea   : > { %4825 = vmatpush3.msra.mxu0 %v1268_v7  ;;  %4826 = vmatprep.mubr.msk.f32.mxu0 %vm5472_vm0, %v5473_v1  ;;  %v5233_v6 = vpack.c.bf16 %v1930_v5, %v1929_v4  ;;  %v1931_v7 = vld [vmem:[#allocation2 + $0xd0] sm:$0xff] }
 0x9eb   : > { %4834 = vmatprep.subr.mxu0 %v5473_v1 }
 0x9f1   : > { %4827 = vmatmul.mubr.msk.f32.vlgmr.msra.gmra.mrb[8].mxu0 %vm1013_vm3, %v1352_v11  ;;  %v5236_v11 = vpack.c.bf16 %v1932_v8, %v1931_v7  ;;  %v2247_v7 = vld [vmem:[%s6062_s3] sm:$0xff] }
 0x9f2   : > { %4835 = vmatpush3.msra.mxu0 %v1433_v13  ;;  %4836 = vmatprep.mubr.msk.f32.mxu0 %vm5472_vm0, %v5473_v1  ;;  %v1933_v13 = vld [vmem:[#allocation2 + $0xe0] sm:$0xff] }
 0x9f3   : > { %5202 = vmatprep.subr.bf16.mxu0 %v5471_v0 }
 0x9f9   : > { %4837 = vmatmul.mubr.msk.f32.vlgmr.msra.gmra.mrb[8].mxu0 %vm1013_vm3, %v1517_v15  ;;  %v5239_v15 = vpack.c.bf16 %v1934_v14, %v1933_v13 }
 0x9fa   : > { %4858 = vmatprep.mubr.msk.f32.mxu0 %vm5472_vm0, %v5473_v1  ;;  %5204 = vmatpush3.bf16.msra.mxu0 %v5203_v32  ;;  %v2009_v32 = vld [vmem:[#allocation2 + $0x290] sm:$0xff] }
 0x9fb   : > { %5205 = vmatprep.subr.bf16.mxu0 %v5471_v0  ;;  %v5248_v34 = vpack.c.bf16 %v2010_v33, %v2009_v32 }
 0x9fe   : > { %5207 = vmatpush3.bf16.msra.mxu0 %v5206_v35  ;;  %v2089_v35 = vld [vmem:[#allocation2 + $0x2a0] sm:$0xff] }
 0x9ff   : > { %5220 = vmatprep.subr.bf16.mxu0 %v5471_v0 }
 0xacc   : > { %v1587_v17 = vpop.f32.mrb[8].mxu0 }
 0xacd   : > { %v4838_v18 = vpop.f32.mrb[9].mxu0  ;;  %4848 = vmatmul.mubr.msk.f32.vlgmr.msra.gmra.mrb[16].mxu1 %vm321_vm1, %v1587_v17  ;;  %v1935_v17 = vld [vmem:[#allocation2 + $0xf0] sm:$0xff] }
 0xace   : > { %4877 = vmatprep.mubr.msk.f32.mxu1 %vm5472_vm0, %v5473_v1  ;;  %v1936_v18 = vld [vmem:[#allocation2 + $0xf8] sm:$0xff] }
 0xba0   : > { %v1670_v20 = vpop.f32.mrb[16].mxu1 }
 0xba1   : > { %v1671_v21 = vadd.f32 %v4412_v12, %v1670_v20  ;;  %v4849_v22 = vpop.f32.mrb[17].mxu1  ;;  %v5242_v12 = vpack.c.bf16 %v1936_v18, %v1935_v17  ;;  %v1920_v20 = vld [vmem:[%s220_s22] sm:$0xff] }
 0xba2   : > { %v1790_v22 = vld [vmem:[#allocation2 + $0x278] sm:$0xff] }
 0xba3   : > { %v1674_v23 = vadd.f32 %v1671_v21, %v5624_v58  ;;  %v1783_v58 = vld [vmem:[#allocation2 + $0x240] sm:$0xff]  ;;  %v1789_v21 = vld [vmem:[#allocation2 + $0x270] sm:$0xff] }
 0xba4   : > { %v5209_v38 = vpack.c.bf16 %v1784_v36, %v1783_v58  ;;  %v2090_v58 = vld [vmem:[#allocation2 + $0x2a8] sm:$0xff] }
 0xba5   : > { %v1675_v24 = vsel %vm321_vm1, %v1674_v23, 0.0  ;;  %v5251_v36 = vpack.c.bf16 %v2090_v58, %v2089_v35 }
 0xba6   : > { %1676 = vadd.xlane.f32.xlu0 %v1675_v24  ;;  %5210 = vmatpush3.bf16.msra.mxu1 %v5209_v38  ;;  %v4416_v24 = vld [vmem:[%s6062_s3 + $0x16] ss:$0 sm:$0xff]  ;;  %v2092_v38 = vld [vmem:[#allocation2 + $0x2b8] sm:$0xff] }
 0xba7   : > { %5211 = vmatprep.subr.bf16.mxu1 %v5471_v0  ;;  %v5254_v41 = vpack.c.bf16 %v2092_v38, %v2091_v37 }
 0xbaa   : > { %5213 = vmatpush3.bf16.msra.mxu1 %v5212_v40 }
 0xbab   : > { %5214 = vmatprep.subr.bf16.mxu1 %v5471_v0 }
 0xbae   : > { %5216 = vmatpush3.bf16.msra.mxu1 %v5215_v43  ;;  %v2169_v43 = vld [vmem:[#allocation2 + $0x2c8] sm:$0xff] }
 0xbaf   : > { %5217 = vmatprep.subr.bf16.mxu1 %v5471_v0 }
 0xc33   : > { %v1677_v25 = vpop.xlane.xlu0 %1676 }
 0xc34   : > { %v1678_v26 = vmul.f32 0.03125, %v1677_v25  ;;  %v2007_v25 = vld [vmem:[#allocation2 + $0x280] sm:$0xff] }
 0xc36   : > { %v1679_v27 = vsub.f32 %v1674_v23, %v1678_v26  ;;  %v5218_v23 = vpack.c.bf16 %v1790_v22, %v1789_v21  ;;  %v2008_v26 = vld [vmem:[#allocation2 + $0x288] sm:$0xff] }
 0xc37   : > { %v5245_v30 = vpack.c.bf16 %v2008_v26, %v2007_v25 }
 0xc38   : > { %v1680_v28 = vmul.f32 %v1679_v27, %v1679_v27  ;;  %5219 = vmatpush3.bf16.msra.mxu1 %v5218_v23 }
 0xc39   : > { %5244 = vmatprep.subr.bf16.mxu1 %v5471_v0 }
 0xc3a   : > { %v1681_v29 = vsel %vm321_vm1, %v1680_v28, 0.0 }
 0xc3b   : > { %1682 = vadd.xlane.f32.xlu1 %v1681_v29 }
 0xcc8   : > { %v1683_v44 = vpop.xlane.xlu1 %1682 }
 0xcc9   : > { %v1684_v45 = vmul.f32 0.03125, %v1683_v44  ;;  %v5257_v44 = vpack.c.bf16 %v2169_v43, %v2168_v42 }
 0xccb   : > { %v1685_v46 = vadd.f32 1e-05, %v1684_v45  ;;  %v2170_v45 = vld [vmem:[#allocation2 + $0x2d0] sm:$0xff] }
 0xccd   : > { %5378 = vrsqrt.f32 %v1685_v46  ;;  %v2171_v46 = vld [vmem:[#allocation2 + $0x2d8] sm:$0xff] }
 0xcd7   : > { %v5379_v47 = vpop.eup %5378 }
 0xcd8   : > { %v1687_v49 = vmul.f32 %v5379_v47, %v1679_v27  ;;  %v5260_v47 = vpack.c.bf16 %v2171_v46, %v2170_v45 }
 0xcda   : > { %v1693_v53 = vmul.f32 %v4414_v48, %v1687_v49 }
 0xcdc   : > { %v5749_v55 = vadd.f32 %v4415_v52, %v1693_v53  ;;  %v4426_v52 = vld [vmem:[%s6062_s3 + $0x1f] ss:$0 sm:$0xff] }
 0xcde   : > { %4859 = vmatmul.mubr.msk.f32.vlgmr.msra.gmra.mrb[10].mxu0 %vm321_vm1, %v5749_v55 }
 0xcdf   : > { %5222 = vmatpush3.bf16.msra.mxu0 %v5221_v54  ;;  %4912 = vmatprep.mubr.msk.f32.mxu0 %vm5472_vm0, %v5473_v1 }
 0xce0   : > { %5223 = vmatprep.subr.bf16.mxu0 %v5471_v0 }
 0xce3   : > { %5225 = vmatpush3.bf16.msra.mxu0 %v5224_v59 }
 0xce4   : > { %5226 = vmatprep.subr.bf16.mxu0 %v5471_v0 }
 0xce7   : > { %5228 = vmatpush3.bf16.msra.mxu0 %v5227_v62  ;;  %v4428_v62 = vld [vmem:[%s6062_s3 + $0x20] ss:$0 sm:$0xff] }
 0xce8   : > { %5229 = vmatprep.subr.bf16.mxu0 %v5471_v0 }
 0xceb   : > { %5231 = vmatpush3.bf16.msra.mxu0 %v5230_v3 }
 0xcec   : > { %5232 = vmatprep.subr.bf16.mxu0 %v5471_v0 }
 0xcef   : > { %5234 = vmatpush3.bf16.msra.mxu0 %v5233_v6 }
 0xcf0   : > { %5235 = vmatprep.subr.bf16.mxu0 %v5471_v0 }
 0xcf3   : > { %5237 = vmatpush3.bf16.msra.mxu0 %v5236_v11 }
 0xcf4   : > { %5238 = vmatprep.subr.bf16.mxu0 %v5471_v0 }
 0xcf7   : > { %5240 = vmatpush3.bf16.msra.mxu0 %v5239_v15 }
 0xcf8   : > { %5241 = vmatprep.subr.bf16.mxu0 %v5471_v0 }
 0xcfb   : > { %5243 = vmatpush3.bf16.msra.mxu0 %v5242_v12 }
 0xcfc   : > { %4948 = vmatprep.subr.mxu0 %v5473_v1 }
 0xcfe   : > { %4913 = vmatmul.mubr.f32.vlgmr.msra.gmra.mrb[12].mxu0 %v1920_v20 }
 0xcff   : > { %4950 = vmatprep.mubr.msk.f32.mxu0 %vm5472_vm0, %v5473_v1 }
 0xdb1   : > { %v1778_v27 = vpop.f32.mrb[10].mxu0 }
 0xdb2   : > { %v1779_v28 = vadd.f32 %v4416_v24, %v1778_v27  ;;  %v4860_v29 = vpop.f32.mrb[11].mxu0 }
 0xdb4   : > { %v1782_v31 = vmax.f32 %v1779_v28, 0.0 }
 0xdb6   : > { %4878 = vmatmul.mubr.msk.f32.vlgmr.msra.gmra.mrb[18].mxu1 %vm600_vm2, %v1782_v31 }
 0xdb7   : > { %5246 = vmatpush3.bf16.msra.mxu1 %v5245_v30  ;;  %4923 = vmatprep.mubr.msk.f32.mxu1 %vm5472_vm0, %v5473_v1 }
 0xdb8   : > { %5247 = vmatprep.subr.bf16.mxu1 %v5471_v0 }
 0xdbb   : > { %5249 = vmatpush3.bf16.msra.mxu1 %v5248_v34 }
 0xdbc   : > { %5250 = vmatprep.subr.bf16.mxu1 %v5471_v0 }
 0xdd1   : > { %v5778_v39 = vpop.f32.mrb[12].mxu0 }
 0xdd2   : > { %v4914_v40 = vpop.f32.mrb[13].mxu0  ;;  %4924 = vmatmul.mubr.msk.f32.vlgmr.msra.gmra.mrb[20].mxu1 %vm321_vm1, %v5778_v39 }
 0xdd3   : > { %5252 = vmatpush3.bf16.msra.mxu1 %v5251_v36  ;;  %4934 = vmatprep.mubr.msk.f32.mxu1 %vm5472_vm0, %v5473_v1  ;;  %v4418_v40 = vld [vmem:[%s6062_s3 + $0x17] ss:$0 sm:$0xff] }
 0xdd4   : > { %5253 = vmatprep.subr.bf16.mxu1 %v5471_v0 }
 0xdd7   : > { %5255 = vmatpush3.bf16.msra.mxu1 %v5254_v41 }
 0xdd8   : > { %5256 = vmatprep.subr.bf16.mxu1 %v5471_v0 }
 0xdda   : > { %4935 = vmatmul.mubr.msk.f32.vlgmr.msra.gmra.mrb[22].mxu1 %vm321_vm1, %v5778_v39 }
 0xddb   : > { %5258 = vmatpush3.bf16.msra.mxu1 %v5257_v44  ;;  %4945 = vmatprep.mubr.msk.f32.mxu1 %vm5472_vm0, %v5473_v1 }
 0xddc   : > { %5259 = vmatprep.subr.bf16.mxu1 %v5471_v0 }
 0xddf   : > { %5261 = vmatpush3.bf16.msra.mxu1 %v5260_v47 }
 0xde0   : > { %4953 = vmatprep.subr.mxu1 %v5473_v1 }
 0xde2   : > { %4946 = vmatmul.mubr.msk.f32.vlgmr.msra.gmra.mrb[24].mxu1 %vm321_vm1, %v5778_v39 }
 0xde3   : > { %4955 = vmatprep.mubr.msk.f32.mxu1 %vm5472_vm0, %v5473_v1 }
 0xe89   : > { %v5796_v48 = vpop.f32.mrb[18].mxu1 }
 0xe8a   : > { %v4879_v49 = vpop.f32.mrb[19].mxu1  ;;  %v1866_v43 = vadd.f32 %v4418_v40, %v5796_v48 }
 0xe8c   : > { %v1869_v49 = vadd.f32 %v1866_v43, %v5749_v55 }
 0xea5   : > { %v2085_v50 = vpop.f32.mrb[20].mxu1 }
 0xea6   : > { %v4925_v51 = vpop.f32.mrb[21].mxu1  ;;  %v2086_v61 = vadd.f32 %v4424_v57, %v2085_v50 }
 0xea7   : > { %v1870_v51 = vsel %vm321_vm1, %v1869_v49, 0.0 }
 0xead   : > { %v2164_v53 = vpop.f32.mrb[22].mxu1 }
 0xeae   : > { %v2165_v54 = vadd.f32 %v4426_v52, %v2164_v53  ;;  %v4936_v56 = vpop.f32.mrb[23].mxu1 }
 0xeb0   : > { %v2248_v59 = vmul.f32 %v5649_v9, %v2165_v54  ;;  %v2337_v60 = vmul.f32 %v5654_v10, %v2165_v54  ;;  %v2569_v63 = vmul.f32 %v5668_v16, %v2165_v54  ;;  %v2729_v5 = vmul.f32 %v5681_v19, %v2165_v54 }
 0xeb2   : > { %4949 = vmatpush3.xpose.msk.msra.mxu0 %vm321_vm1, %v2248_v59  ;;  %4954 = vmatpush3.xpose.msk.msra.mxu1 %vm321_vm1, %v2337_v60 }
 0xeb3   : > { %4968 = vmatprep.subr.mxu1 %v5473_v1  ;;  %4958 = vmatprep.subr.mxu0 %v5473_v1 }
 0xeb5   : > { %v2243_v2 = vpop.f32.mrb[24].mxu1  ;;  %4951 = vmatmul.mubr.msk.f32.vlgmr.msra.gmra.mrb[14].mxu0 %vm321_vm1, %v2086_v61  ;;  %4956 = vmatmul.mubr.msk.f32.vlgmr.msra.gmra.mrb[26].mxu1 %vm321_vm1, %v2086_v61 }
 0xeb6   : > { %v5816_v3 = vadd.f32 %v4428_v62, %v2243_v2  ;;  %v4947_v4 = vpop.f32.mrb[25].mxu1  ;;  %4969 = vmatpush3.xpose.msk.msra.mxu1 %vm321_vm1, %v2569_v63  ;;  %4970 = vmatprep.mubr.msk.f32.mxu1 %vm5472_vm0, %v5473_v1 }
 0xeb7   : > { %4978 = vmatprep.subr.mxu1 %v5473_v1  ;;  %4960 = vmatprep.mubr.msk.f32.mxu0 %vm5472_vm0, %v5473_v1 }
 0xeb8   : > { %v2338_v6 = vmul.f32 %v5654_v10, %v5816_v3  ;;  %v2249_v55 = vmul.f32 %v5649_v9, %v5816_v3 }
 0xeb9   : > { %4971 = vmatmul.mubr.msk.f32.vlgmr.msra.gmra.mrb[28].mxu1 %vm321_vm1, %v2086_v61 }
 0xeba   : > { %4959 = vmatpush3.msra.mxu0 %v2338_v6  ;;  %4979 = vmatpush3.xpose.msk.msra.mxu1 %vm321_vm1, %v2729_v5  ;;  %v2570_v6 = vmul.f32 %v5668_v16, %v5816_v3 }
 0xebb   : > { %4980 = vmatprep.mubr.msk.f32.mxu1 %vm5472_vm0, %v5473_v1  ;;  %4963 = vmatprep.subr.mxu0 %v5473_v1 }
 0xebc   : > { %5262 = vmatprep.subr.bf16.mxu1 %v5471_v0 }
 0xebd   : > { %4981 = vmatmul.mubr.msk.f32.vlgmr.msra.gmra.mrb[30].mxu1 %vm321_vm1, %v2086_v61 }
 0xebe   : > { %4996 = vmatprep.mubr.msk.f32.mxu1 %vm5472_vm0, %v5473_v1 }
 0xf88   : > { %v2322_v8 = vpop.f32.mrb[14].mxu0  ;;  %v2408_v11 = vpop.f32.mrb[26].mxu1 }
 0xf89   : > { %v2323_v13 = vadd.f32 %v2322_v8, %v2247_v7  ;;  %v2409_v14 = vadd.f32 %v2408_v11, %v2247_v7  ;;  %v4952_v15 = vpop.f32.mrb[15].mxu0  ;;  %v4957_v17 = vpop.f32.mrb[27].mxu1  ;;  %v2730_v11 = vmul.f32 %v5681_v19, %v5816_v3  ;;  %v2892_v3 = vld [vmem:[#allocation2 + $0x2f8] sm:$0xff] }
 0xf8a   : > { %v2889_v15 = vld [vmem:[#allocation2 + $0x2e0] sm:$0xff]  ;;  %v2890_v17 = vld [vmem:[#allocation2 + $0x2e8] sm:$0xff] }
 0xf8b   : > { %v2412_v18 = vsel %vm1013_vm3, %v2409_v14, -inf  ;;  %v2326_v12 = vsel %vm1013_vm3, %v2323_v13, -inf }
 0xf8c   : > { %2413 = vmax.xlane.f32.xlu0 %v2412_v18  ;;  %v2640_v20 = vpop.f32.mrb[28].mxu1  ;;  %2327 = vmax.xlane.f32.xlu1 %v2326_v12  ;;  %v2891_v18 = vld [vmem:[#allocation2 + $0x2f0] sm:$0xff]  ;;  %v5263_v12 = vpack.c.bf16 %v2890_v17, %v2889_v15 }
 0xf8d   : > { %v2641_v21 = vadd.f32 %v2640_v20, %v2247_v7  ;;  %v4972_v22 = vpop.f32.mrb[29].mxu1  ;;  %v5266_v20 = vpack.c.bf16 %v2892_v3, %v2891_v18 }
 0xf8e   : > { %5264 = vmatpush3.bf16.msra.mxu1 %v5263_v12 }
 0xf8f   : > { %v2644_v23 = vsel %vm1013_vm3, %v2641_v21, -inf  ;;  %5265 = vmatprep.subr.bf16.mxu1 %v5471_v0 }
 0xf90   : > { %2645 = vmax.xlane.f32.xlu0 %v2644_v23  ;;  %v2800_v24 = vpop.f32.mrb[30].mxu1 }
 0xf91   : > { %v2801_v25 = vadd.f32 %v2800_v24, %v2247_v7  ;;  %v4982_v26 = vpop.f32.mrb[31].mxu1 }
 0xf92   : > { %5267 = vmatpush3.bf16.msra.mxu1 %v5266_v20 }
 0xf93   : > { %v2804_v27 = vsel %vm1013_vm3, %v2801_v25, -inf  ;;  %5274 = vmatprep.subr.bf16.mxu1 %v5471_v0 }
 0xf94   : > { %2805 = vmax.xlane.f32.xlu1 %v2804_v27  ;;  %v4421_v27 = vld [vmem:[%s6062_s3 + $0x1b] ss:$0 sm:$0xff] }
0x1019   : > { %v2414_v28 = vpop.xlane.xlu0 %2413  ;;  %v2328_v29 = vpop.xlane.xlu1 %2327 }
0x101a   : > { %v2415_v30 = vsub.f32 %v2409_v14, %v2414_v28  ;;  %v2329_v31 = vsub.f32 %v2323_v13, %v2328_v29 }
0x101c   : > { %v2416_v32 = vmul.f32 1.442695, %v2415_v30  ;;  %v2330_v33 = vmul.f32 1.442695, %v2329_v31 }
0x101d   : > { %v2646_v34 = vpop.xlane.xlu0 %2645 }
0x101e   : > { %5380 = vpow2.f32 %v2416_v32  ;;  %v2647_v35 = vsub.f32 %v2641_v21, %v2646_v34 }
0x101f   : > { %5382 = vpow2.f32 %v2330_v33 }
0x1020   : > { %v2648_v58 = vmul.f32 1.442695, %v2647_v35 }
0x1021   : > { %v2806_v36 = vpop.xlane.xlu1 %2805 }
0x1022   : > { %5384 = vpow2.f32 %v2648_v58  ;;  %v2807_v37 = vsub.f32 %v2801_v25, %v2806_v36  ;;  %v4420_v25 = vld [vmem:[%s6062_s3 + $0x1a] ss:$0 sm:$0xff] }
0x1024   : > { %v2808_v38 = vmul.f32 1.442695, %v2807_v37  ;;  %v3079_v37 = vld [vmem:[#allocation2 + $0x320] sm:$0xff] }
0x1026   : > { %5386 = vpow2.f32 %v2808_v38  ;;  %v3080_v38 = vld [vmem:[#allocation2 + $0x328] sm:$0xff] }
0x1027   : > { %v5275_v40 = vpack.c.bf16 %v3080_v38, %v3079_v37 }
0x1028   : > { %v5381_v41 = vpop.eup %5380 }
0x1029   : > { %v5383_v42 = vpop.eup %5382  ;;  %v2418_v44 = vsel %vm1013_vm3, %v5381_v41, 0.0 }
0x102a   : > { %2419 = vadd.xlane.f32.xlu0 %v2418_v44  ;;  %v2332_v45 = vsel %vm1013_vm3, %v5383_v42, 0.0  ;;  %v4442_v44 = vld [vmem:[%s6062_s3 + $0x21] ss:$0 sm:$0xff] }
0x102b   : > { %2333 = vadd.xlane.f32.xlu1 %v2332_v45 }
0x102c   : > { %v5385_v46 = vpop.eup %5384 }
0x102d   : > { %v2650_v47 = vsel %vm1013_vm3, %v5385_v46, 0.0 }
0x102e   : > { %2651 = vadd.xlane.f32.xlu0 %v2650_v47 }
0x1030   : > { %v5387_v50 = vpop.eup %5386 }
0x1031   : > { %v2810_v52 = vsel %vm1013_vm3, %v5387_v50, 0.0 }
0x1032   : > { %1871 = vadd.xlane.f32.xlu0 %v1870_v51  ;;  %2811 = vadd.xlane.f32.xlu1 %v2810_v52 }
0x10b7   : > { %v2420_v48 = vpop.xlane.xlu0 %2419 }
0x10b8   : > { %5388 = vrcp.f32 %v2420_v48  ;;  %v2334_v53 = vpop.xlane.xlu1 %2333 }
0x10b9   : > { %5390 = vrcp.f32 %v2334_v53 }
0x10bb   : > { %v2652_v54 = vpop.xlane.xlu0 %2651 }
0x10bc   : > { %5392 = vrcp.f32 %v2652_v54  ;;  %v4422_v54 = vld [vmem:[%s6062_s3 + $0x1c] ss:$0 sm:$0xff] }
0x10bf   : > { %v1872_v56 = vpop.xlane.xlu0 %1871  ;;  %v2812_v5 = vpop.xlane.xlu1 %2811 }
0x10c0   : > { %v1873_v57 = vmul.f32 0.03125, %v1872_v56  ;;  %5394 = vrcp.f32 %v2812_v5 }
0x10c2   : > { %v5389_v59 = vpop.eup %5388  ;;  %v1874_v60 = vsub.f32 %v1869_v49, %v1873_v57  ;;  %v4423_v57 = vld [vmem:[%s6062_s3 + $0x1d] ss:$0 sm:$0xff] }
0x10c3   : > { %v2422_v61 = vmul.f32 %v5389_v59, %v5381_v41  ;;  %v5391_v2 = vpop.eup %5390  ;;  %v3081_v41 = vld [vmem:[#allocation2 + $0x330] sm:$0xff] }
0x10c4   : > { %v1875_v62 = vmul.f32 %v1874_v60, %v1874_v60  ;;  %v2336_v4 = vmul.f32 %v5391_v2, %v5383_v42  ;;  %v3082_v42 = vld [vmem:[#allocation2 + $0x338] sm:$0xff]  ;;  %v2997_v2 = vld [vmem:[#allocation2 + $0x300] sm:$0xff] }
0x10c5   : > { %4961 = vmatmul.mubr.msk.f32.vlgmr.msra.gmra.mrb[16].mxu0 %vm1013_vm3, %v2422_v61  ;;  %v5278_v43 = vpack.c.bf16 %v3082_v42, %v3081_v41 }
0x10c6   : > { %4964 = vmatpush3.msra.mxu0 %v2249_v55  ;;  %v1876_v63 = vsel %vm321_vm1, %v1875_v62, 0.0  ;;  %4965 = vmatprep.mubr.msk.f32.mxu0 %vm5472_vm0, %v5473_v1  ;;  %v5393_v7 = vpop.eup %5392 }
0x10c7   : > { %1877 = vadd.xlane.f32.xlu1 %v1876_v63  ;;  %4973 = vmatprep.subr.mxu0 %v5473_v1  ;;  %v2654_v8 = vmul.f32 %v5393_v7, %v5385_v46  ;;  %v3000_v7 = vld [vmem:[#allocation2 + $0x318] sm:$0xff] }
0x10ca   : > { %v5395_v13 = vpop.eup %5394 }
0x10cb   : > { %v2814_v14 = vmul.f32 %v5395_v13, %v5387_v50 }
0x10cd   : > { %4966 = vmatmul.mubr.msk.f32.vlgmr.msra.gmra.mrb[16].mxu0 %vm1013_vm3, %v2336_v4  ;;  %v2998_v4 = vld [vmem:[#allocation2 + $0x308] sm:$0xff] }
0x10ce   : > { %4974 = vmatpush3.msra.mxu0 %v2570_v6  ;;  %4975 = vmatprep.mubr.msk.f32.mxu0 %vm5472_vm0, %v5473_v1  ;;  %v5269_v5 = vpack.c.bf16 %v2998_v4, %v2997_v2  ;;  %v2999_v6 = vld [vmem:[#allocation2 + $0x310] sm:$0xff] }
0x10cf   : > { %4983 = vmatprep.subr.mxu0 %v5473_v1 }
0x10d5   : > { %4976 = vmatmul.mubr.msk.f32.vlgmr.msra.gmra.mrb[16].mxu0 %vm1013_vm3, %v2654_v8  ;;  %v5272_v8 = vpack.c.bf16 %v3000_v7, %v2999_v6 }
0x10d6   : > { %4984 = vmatpush3.msra.mxu0 %v2730_v11  ;;  %4985 = vmatprep.mubr.msk.f32.mxu0 %vm5472_vm0, %v5473_v1  ;;  %v4448_v11 = vld [vmem:[%s6062_s3 + $0x23] ss:$0 sm:$0xff] }
0x10d7   : > { %5268 = vmatprep.subr.bf16.mxu0 %v5471_v0 }
0x10dd   : > { %4986 = vmatmul.mubr.msk.f32.vlgmr.msra.gmra.mrb[16].mxu0 %vm1013_vm3, %v2814_v14 }
0x10de   : > { %5007 = vmatprep.mubr.msk.f32.mxu0 %vm5472_vm0, %v5473_v1  ;;  %5270 = vmatpush3.bf16.msra.mxu0 %v5269_v5 }
0x10df   : > { %5271 = vmatprep.subr.bf16.mxu0 %v5471_v0 }
0x10e2   : > { %5273 = vmatpush3.bf16.msra.mxu0 %v5272_v8 }
0x10e3   : > { %5280 = vmatprep.subr.bf16.mxu0 %v5471_v0 }
0x1154   : > { %v1878_v21 = vpop.xlane.xlu1 %1877 }
0x1155   : > { %v1879_v22 = vmul.f32 0.03125, %v1878_v21  ;;  %v4444_v21 = vld [vmem:[%s6062_s3 + $0x28] ss:$0 sm:$0xff] }
0x1157   : > { %v1880_v23 = vadd.f32 1e-05, %v1879_v22 }
0x1159   : > { %5396 = vrsqrt.f32 %v1880_v23  ;;  %v3161_v23 = vld [vmem:[#allocation2 + $0x340] sm:$0xff] }
0x1163   : > { %v5397_v24 = vpop.eup %5396 }
0x1164   : > { %v1882_v26 = vmul.f32 %v5397_v24, %v1874_v60  ;;  %v3162_v24 = vld [vmem:[#allocation2 + $0x348] sm:$0xff] }
0x1166   : > { %v1888_v28 = vmul.f32 %v4420_v25, %v1882_v26  ;;  %v5281_v26 = vpack.c.bf16 %v3162_v24, %v3161_v23 }
0x1168   : > { %v1894_v29 = vadd.f32 %v4421_v27, %v1888_v28  ;;  %v3163_v28 = vld [vmem:[#allocation2 + $0x350] sm:$0xff] }
0x116a   : > { %v1895_v30 = vsel %vm321_vm1, %v1894_v29, 0.0 }
0x116b   : > { %1896 = vadd.xlane.f32.xlu0 %v1895_v30 }
0x11b0   : > { %v2884_v31 = vpop.f32.mrb[16].mxu0 }
0x11b1   : > { %v4987_v32 = vpop.f32.mrb[17].mxu0  ;;  %4997 = vmatmul.mubr.msk.f32.vlgmr.msra.gmra.mrb[32].mxu1 %vm321_vm1, %v2884_v31  ;;  %v4446_v31 = vld [vmem:[%s6062_s3 + $0x22] ss:$0 sm:$0xff] }
0x11b2   : > { %5018 = vmatprep.mubr.msk.f32.mxu1 %vm5472_vm0, %v5473_v1  ;;  %5276 = vmatpush3.bf16.msra.mxu1 %v5275_v40 }
0x11b3   : > { %5277 = vmatprep.subr.bf16.mxu1 %v5471_v0 }
0x11b6   : > { %5279 = vmatpush3.bf16.msra.mxu1 %v5278_v43 }
0x11b7   : > { %5032 = vmatprep.subr.mxu1 %v5473_v1 }
0x11f8   : > { %v1897_v33 = vpop.xlane.xlu0 %1896 }
0x11f9   : > { %v1898_v34 = vmul.f32 0.03125, %v1897_v33 }
0x11fb   : > { %v1899_v35 = vsub.f32 %v1894_v29, %v1898_v34  ;;  %v3164_v29 = vld [vmem:[#allocation2 + $0x358] sm:$0xff] }
0x11fc   : > { %v5284_v30 = vpack.c.bf16 %v3164_v29, %v3163_v28 }
0x11fd   : > { %v1900_v58 = vmul.f32 %v1899_v35, %v1899_v35 }
0x11ff   : > { %v1901_v36 = vsel %vm321_vm1, %v1900_v58, 0.0 }
0x1200   : > { %1902 = vadd.xlane.f32.xlu0 %v1901_v36  ;;  %v4450_v36 = vld [vmem:[%s6062_s3 + $0x24] ss:$0 sm:$0xff] }
0x1284   : > { %v2967_v45 = vpop.f32.mrb[32].mxu1 }
0x1285   : > { %v2968_v46 = vadd.f32 %v4442_v44, %v2967_v45  ;;  %v4998_v47 = vpop.f32.mrb[33].mxu1 }
0x1287   : > { %v2971_v49 = vadd.f32 %v2968_v46, %v5778_v39 }
0x1289   : > { %v2972_v50 = vsel %vm321_vm1, %v2971_v49, 0.0 }
0x128a   : > { %2973 = vadd.xlane.f32.xlu1 %v2972_v50 }
0x128d   : > { %v1903_v51 = vpop.xlane.xlu0 %1902 }
0x128e   : > { %v1904_v52 = vmul.f32 0.03125, %v1903_v51 }
0x1290   : > { %v1905_v48 = vadd.f32 1e-05, %v1904_v52 }
0x1292   : > { %5398 = vrsqrt.f32 %v1905_v48 }
0x129c   : > { %v5399_v53 = vpop.eup %5398 }
0x129d   : > { %v1907_v56 = vmul.f32 %v5399_v53, %v1899_v35 }
0x129f   : > { %v1913_v59 = vmul.f32 %v4422_v54, %v1907_v56 }
0x12a1   : > { %v1919_v60 = vadd.f32 %v4423_v57, %v1913_v59 }
0x12a3   : > { %5019 = vmatmul.mubr.msk.f32.vlgmr.msra.gmra.mrb[34].mxu1 %vm321_vm1, %v1919_v60 }
0x12a4   : > { %5034 = vmatprep.mubr.msk.f32.mxu1 %vm5472_vm0, %v5473_v1 }
0x1317   : > { %v2974_v39 = vpop.xlane.xlu1 %2973 }
0x1318   : > { %v2975_v61 = vmul.f32 0.03125, %v2974_v39 }
0x131a   : > { %v2976_v55 = vsub.f32 %v2971_v49, %v2975_v61 }
0x131c   : > { %v2977_v62 = vmul.f32 %v2976_v55, %v2976_v55 }
0x131e   : > { %v2978_v63 = vsel %vm321_vm1, %v2977_v62, 0.0 }
0x131f   : > { %2979 = vadd.xlane.f32.xlu1 %v2978_v63 }
0x1376   : > { %v3157_v13 = vpop.f32.mrb[34].mxu1 }
0x1377   : > { %v3158_v14 = vadd.f32 %v4448_v11, %v3157_v13  ;;  %v5020_v15 = vpop.f32.mrb[35].mxu1 }
0x1378   : > { %v3881_v15 = vld [vmem:[#allocation2 + $0x360] sm:$0xff] }
0x1379   : > { %v3240_v17 = vmul.f32 %v5649_v9, %v3158_v14  ;;  %v4445_v9 = vld [vmem:[%s6062_s3 + $0x29] ss:$0 sm:$0xff]  ;;  %v3329_v35 = vmul.f32 %v5654_v10, %v3158_v14  ;;  %v3561_v58 = vmul.f32 %v5668_v16, %v3158_v14  ;;  %v3721_v40 = vmul.f32 %v5681_v19, %v3158_v14 }
0x137a   : > { %v5424_v16 = vld [vmem:[%s6062_s3 + $0x9] ss:$0 sm:$0xff] }
0x137b   : > { %5033 = vmatpush3.xpose.msk.msra.mxu1 %vm321_vm1, %v3240_v17  ;;  %v3882_v17 = vld [vmem:[#allocation2 + $0x368] sm:$0xff] }
0x137c   : > { %5037 = vmatprep.subr.mxu1 %v5473_v1 }
0x13ac   : > { %v2980_v18 = vpop.xlane.xlu1 %2979 }
0x13ad   : > { %v2981_v12 = vmul.f32 0.03125, %v2980_v18  ;;  %v3883_v18 = vld [vmem:[#allocation2 + $0x370] sm:$0xff] }
0x13af   : > { %v2982_v3 = vadd.f32 1e-05, %v2981_v12  ;;  %v5287_v12 = vpack.c.bf16 %v3882_v17, %v3881_v15  ;;  %v4079_v15 = vld [vmem:[#allocation2 + $0x3d8] sm:$0xff] }
0x13b1   : > { %5400 = vrsqrt.f32 %v2982_v3  ;;  %v3884_v3 = vld [vmem:[#allocation2 + $0x378] sm:$0xff] }
0x13bb   : > { %v5401_v20 = vpop.eup %5400 }
0x13bc   : > { %v2984_v22 = vmul.f32 %v5401_v20, %v2976_v55  ;;  %v5290_v20 = vpack.c.bf16 %v3884_v3, %v3883_v18  ;;  %v4468_v18 = vld [vmem:[%s6062_s3 + $0x26] ss:$0 sm:$0xff] }
0x13be   : > { %v2990_v25 = vmul.f32 %v4444_v21, %v2984_v22 }
0x13c0   : > { %v5919_v27 = vadd.f32 %v4445_v9, %v2990_v25  ;;  %v5425_v25 = vld [vmem:[%s6062_s3 + $0x8] ss:$0 sm:$0xff] }
0x13c2   : > { %5008 = vmatmul.mubr.msk.f32.vlgmr.msra.gmra.mrb[18].mxu0 %vm321_vm1, %v5919_v27 }
0x13c3   : > { %5282 = vmatpush3.bf16.msra.mxu0 %v5281_v26  ;;  %5029 = vmatprep.mubr.msk.f32.mxu0 %vm5472_vm0, %v5473_v1 }
0x13c4   : > { %5283 = vmatprep.subr.bf16.mxu0 %v5471_v0 }
0x13c7   : > { %5285 = vmatpush3.bf16.msra.mxu0 %v5284_v30 }
0x13c8   : > { %5042 = vmatprep.subr.mxu0 %v5473_v1 }
0x13ca   : > { %5030 = vmatmul.mubr.msk.f32.vlgmr.msra.gmra.mrb[20].mxu0 %vm321_vm1, %v1919_v60 }
0x13cb   : > { %5044 = vmatprep.mubr.msk.f32.mxu0 %vm5472_vm0, %v5473_v1 }
0x1495   : > { %v3075_v32 = vpop.f32.mrb[18].mxu0 }
0x1496   : > { %v3076_v33 = vadd.f32 %v4446_v31, %v3075_v32  ;;  %v5009_v34 = vpop.f32.mrb[19].mxu0  ;;  %v5426_v31 = vld [vmem:[%s6062_s3 + $0xa] ss:$0 sm:$0xff] }
0x1498   : > { %5035 = vmatmul.mubr.msk.f32.vlgmr.msra.gmra.mrb[36].mxu1 %vm321_vm1, %v3076_v33 }
0x1499   : > { %5038 = vmatpush3.xpose.msk.msra.mxu1 %vm321_vm1, %v3329_v35  ;;  %5039 = vmatprep.mubr.msk.f32.mxu1 %vm5472_vm0, %v5473_v1  ;;  %v5427_v35 = vld [vmem:[%s6062_s3 + $0xb] ss:$0 sm:$0xff] }
0x149a   : > { %5052 = vmatprep.subr.mxu1 %v5473_v1 }
0x149c   : > { %5040 = vmatmul.mubr.msk.f32.vlgmr.msra.gmra.mrb[38].mxu1 %vm321_vm1, %v3076_v33 }
0x149d   : > { %v3236_v37 = vpop.f32.mrb[20].mxu0  ;;  %5053 = vmatpush3.xpose.msk.msra.mxu1 %vm321_vm1, %v3561_v58  ;;  %5054 = vmatprep.mubr.msk.f32.mxu1 %vm5472_vm0, %v5473_v1 }
0x149e   : > { %v5947_v10 = vadd.f32 %v4450_v36, %v3236_v37  ;;  %v5031_v38 = vpop.f32.mrb[21].mxu0  ;;  %5062 = vmatprep.subr.mxu1 %v5473_v1 }
0x14a0   : > { %5055 = vmatmul.mubr.msk.f32.vlgmr.msra.gmra.mrb[40].mxu1 %vm321_vm1, %v3076_v33  ;;  %v3330_v41 = vmul.f32 %v5424_v16, %v5947_v10  ;;  %v3241_v26 = vmul.f32 %v5425_v25, %v5947_v10  ;;  %v3562_v32 = vmul.f32 %v5426_v31, %v5947_v10  ;;  %v3722_v58 = vmul.f32 %v5427_v35, %v5947_v10  ;;  %v4464_v10 = vld [vmem:[%s6062_s3 + $0x25] ss:$0 sm:$0xff] }
0x14a1   : > { %5063 = vmatpush3.xpose.msk.msra.mxu1 %vm321_vm1, %v3721_v40  ;;  %5064 = vmatprep.mubr.msk.f32.mxu1 %vm5472_vm0, %v5473_v1 }
0x14a2   : > { %5043 = vmatpush3.msra.mxu0 %v3330_v41  ;;  %5286 = vmatprep.subr.bf16.mxu1 %v5471_v0 }
0x14a3   : > { %5047 = vmatprep.subr.mxu0 %v5473_v1 }
0x14a4   : > { %5065 = vmatmul.mubr.msk.f32.vlgmr.msra.gmra.mrb[42].mxu1 %vm321_vm1, %v3076_v33 }
0x14a5   : > { %5080 = vmatprep.mubr.msk.f32.mxu1 %vm5472_vm0, %v5473_v1  ;;  %5288 = vmatpush3.bf16.msra.mxu1 %v5287_v12 }
0x14a6   : > { %5289 = vmatprep.subr.bf16.mxu1 %v5471_v0 }
0x14a9   : > { %5291 = vmatpush3.bf16.msra.mxu1 %v5290_v20 }
0x14aa   : > { %5298 = vmatprep.subr.bf16.mxu1 %v5471_v0 }
0x156b   : > { %v3314_v19 = vpop.f32.mrb[36].mxu1 }
0x156c   : > { %v5036_v42 = vpop.f32.mrb[37].mxu1  ;;  %v3318_v43 = vsel %vm1013_vm3, %v3314_v19, -inf }
0x156d   : > { %3319 = vmax.xlane.f32.xlu1 %v3318_v43 }
0x156f   : > { %v3400_v44 = vpop.f32.mrb[38].mxu1 }
0x1570   : > { %v5041_v45 = vpop.f32.mrb[39].mxu1  ;;  %v3404_v46 = vsel %vm1013_vm3, %v3400_v44, -inf }
0x1571   : > { %3405 = vmax.xlane.f32.xlu0 %v3404_v46 }
0x1573   : > { %v3632_v47 = vpop.f32.mrb[40].mxu1 }
0x1574   : > { %v5056_v49 = vpop.f32.mrb[41].mxu1  ;;  %v3636_v50 = vsel %vm1013_vm3, %v3632_v47, -inf }
0x1575   : > { %3637 = vmax.xlane.f32.xlu0 %v3636_v50  ;;  %v3989_v50 = vld [vmem:[#allocation2 + $0x380] sm:$0xff] }
0x1577   : > { %v3792_v51 = vpop.f32.mrb[42].mxu1 }
0x1578   : > { %v5066_v52 = vpop.f32.mrb[43].mxu1  ;;  %v3796_v48 = vsel %vm1013_vm3, %v3792_v51, -inf }
0x1579   : > { %3797 = vmax.xlane.f32.xlu1 %v3796_v48  ;;  %v3991_v48 = vld [vmem:[#allocation2 + $0x390] sm:$0xff] }
0x15fa   : > { %v3320_v53 = vpop.xlane.xlu1 %3319 }
0x15fb   : > { %v3321_v54 = vsub.f32 %v3314_v19, %v3320_v53  ;;  %v3992_v53 = vld [vmem:[#allocation2 + $0x398] sm:$0xff] }
0x15fd   : > { %v3322_v56 = vmul.f32 1.442695, %v3321_v54  ;;  %v5296_v54 = vpack.c.bf16 %v3992_v53, %v3991_v48 }
0x15fe   : > { %v3406_v57 = vpop.xlane.xlu0 %3405 }
0x15ff   : > { %5402 = vpow2.f32 %v3322_v56  ;;  %v3407_v59 = vsub.f32 %v3400_v44, %v3406_v57  ;;  %v4073_v56 = vld [vmem:[#allocation2 + $0x3a8] sm:$0xff]  ;;  %v4074_v57 = vld [vmem:[#allocation2 + $0x3b0] sm:$0xff] }
0x1601   : > { %v3408_v60 = vmul.f32 1.442695, %v3407_v59 }
0x1602   : > { %v3638_v39 = vpop.xlane.xlu0 %3637 }
0x1603   : > { %5404 = vpow2.f32 %v3408_v60  ;;  %v3639_v61 = vsub.f32 %v3632_v47, %v3638_v39  ;;  %v4075_v60 = vld [vmem:[#allocation2 + $0x3b8] sm:$0xff] }
0x1604   : > { %v5302_v39 = vpack.c.bf16 %v4075_v60, %v4074_v57 }
0x1605   : > { %v3640_v55 = vmul.f32 1.442695, %v3639_v61  ;;  %v4076_v61 = vld [vmem:[#allocation2 + $0x3c0] sm:$0xff] }
0x1606   : > { %v3798_v62 = vpop.xlane.xlu1 %3797 }
0x1607   : > { %5406 = vpow2.f32 %v3640_v55  ;;  %v3799_v63 = vsub.f32 %v3792_v51, %v3798_v62  ;;  %v3990_v51 = vld [vmem:[#allocation2 + $0x388] sm:$0xff] }
0x1608   : > { %v5293_v52 = vpack.c.bf16 %v3990_v51, %v3989_v50  ;;  %v4077_v55 = vld [vmem:[#allocation2 + $0x3c8] sm:$0xff] }
0x1609   : > { %v5403_v2 = vpop.eup %5402  ;;  %v3800_v4 = vmul.f32 1.442695, %v3799_v63  ;;  %v5305_v62 = vpack.c.bf16 %v4077_v55, %v4076_v61 }
0x160a   : > { %v3324_v5 = vsel %vm1013_vm3, %v5403_v2, 0.0 }
0x160b   : > { %5408 = vpow2.f32 %v3800_v4  ;;  %3325 = vadd.xlane.f32.xlu1 %v3324_v5 }
0x160d   : > { %v5405_v6 = vpop.eup %5404 }
0x160e   : > { %v3410_v7 = vsel %vm1013_vm3, %v5405_v6, 0.0 }
0x160f   : > { %3411 = vadd.xlane.f32.xlu0 %v3410_v7 }
0x1611   : > { %v5407_v8 = vpop.eup %5406 }
0x1612   : > { %v3642_v11 = vsel %vm1013_vm3, %v5407_v8, 0.0 }
0x1613   : > { %3643 = vadd.xlane.f32.xlu0 %v3642_v11 }
0x1615   : > { %v5409_v13 = vpop.eup %5408 }
0x1616   : > { %v3802_v14 = vsel %vm1013_vm3, %v5409_v13, 0.0 }
0x1617   : > { %3803 = vadd.xlane.f32.xlu1 %v3802_v14  ;;  %v4078_v14 = vld [vmem:[#allocation2 + $0x3d0] sm:$0xff] }
0x1618   : > { %v5308_v17 = vpack.c.bf16 %v4079_v15, %v4078_v14 }
0x1698   : > { %v3326_v22 = vpop.xlane.xlu1 %3325 }
0x169c   : > { %v3412_v21 = vpop.xlane.xlu0 %3411 }
0x169d   : > { %5410 = vrcp.f32 %v3412_v21 }
0x169e   : > { %5412 = vrcp.f32 %v3326_v22  ;;  %v4470_v22 = vld [vmem:[%s6062_s3 + $0x27] ss:$0 sm:$0xff] }
0x16a0   : > { %v3644_v9 = vpop.xlane.xlu0 %3643 }
0x16a1   : > { %5414 = vrcp.f32 %v3644_v9 }
0x16a4   : > { %v3804_v30 = vpop.xlane.xlu1 %3803 }
0x16a5   : > { %5416 = vrcp.f32 %v3804_v30 }
0x16a7   : > { %v5411_v23 = vpop.eup %5410 }
0x16a8   : > { %v3414_v24 = vmul.f32 %v5411_v23, %v5405_v6  ;;  %v5413_v28 = vpop.eup %5412  ;;  %v4466_v6 = vld [vmem:[%s6062_s3 + $0x2a] ss:$0 sm:$0xff] }
0x16a9   : > { %v3328_v29 = vmul.f32 %v5413_v28, %v5403_v2 }
0x16aa   : > { %5045 = vmatmul.mubr.msk.f32.vlgmr.msra.gmra.mrb[22].mxu0 %vm1013_vm3, %v3414_v24 }
0x16ab   : > { %5048 = vmatpush3.msra.mxu0 %v3241_v26  ;;  %5049 = vmatprep.mubr.msk.f32.mxu0 %vm5472_vm0, %v5473_v1  ;;  %v5415_v33 = vpop.eup %5414 }
0x16ac   : > { %5057 = vmatprep.subr.mxu0 %v5473_v1  ;;  %v3646_v34 = vmul.f32 %v5415_v33, %v5407_v8  ;;  %v4467_v8 = vld [vmem:[%s6062_s3 + $0x2b] ss:$0 sm:$0xff] }
0x16af   : > { %v5417_v36 = vpop.eup %5416 }
0x16b0   : > { %v3806_v37 = vmul.f32 %v5417_v36, %v5409_v13 }
0x16b2   : > { %5050 = vmatmul.mubr.msk.f32.vlgmr.msra.gmra.mrb[22].mxu0 %vm1013_vm3, %v3328_v29 }
0x16b3   : > { %5058 = vmatpush3.msra.mxu0 %v3562_v32  ;;  %5059 = vmatprep.mubr.msk.f32.mxu0 %vm5472_vm0, %v5473_v1 }
0x16b4   : > { %5067 = vmatprep.subr.mxu0 %v5473_v1 }
0x16ba   : > { %5060 = vmatmul.mubr.msk.f32.vlgmr.msra.gmra.mrb[22].mxu0 %vm1013_vm3, %v3646_v34 }
0x16bb   : > { %5068 = vmatpush3.msra.mxu0 %v3722_v58  ;;  %5069 = vmatprep.mubr.msk.f32.mxu0 %vm5472_vm0, %v5473_v1  ;;  %v4472_v58 = vld [vmem:[%s6062_s3 + $0x2c] ss:$0 sm:$0xff] }
0x16bc   : > { %5292 = vmatprep.subr.bf16.mxu0 %v5471_v0 }
0x16c2   : > { %5070 = vmatmul.mubr.msk.f32.vlgmr.msra.gmra.mrb[22].mxu0 %vm1013_vm3, %v3806_v37  ;;  %v4473_v37 = vld [vmem:[%s6062_s3 + $0x2d] ss:$0 sm:$0xff] }
0x16c3   : > { %5091 = vmatprep.mubr.msk.f32.mxu0 %vm5472_vm0, %v5473_v1  ;;  %5294 = vmatpush3.bf16.msra.mxu0 %v5293_v52 }
0x16c4   : > { %5295 = vmatprep.subr.bf16.mxu0 %v5471_v0 }
0x16c7   : > { %5297 = vmatpush3.bf16.msra.mxu0 %v5296_v54  ;;  %v4474_v54 = vld [vmem:[%s6062_s3 + $0x2e] ss:$0 sm:$0xff] }
0x16c8   : > { %5310 = vmatprep.subr.bf16.mxu0 %v5471_v0 }
0x1795   : > { %v3876_v38 = vpop.f32.mrb[22].mxu0 }
0x1796   : > { %v5071_v40 = vpop.f32.mrb[23].mxu0  ;;  %5081 = vmatmul.mubr.msk.f32.vlgmr.msra.gmra.mrb[44].mxu1 %vm321_vm1, %v3876_v38 }
0x1797   : > { %5110 = vmatprep.mubr.msk.f32.mxu1 %vm5472_vm0, %v5473_v1 }
0x1869   : > { %v3959_v16 = vpop.f32.mrb[44].mxu1 }
0x186a   : > { %v3960_v41 = vadd.f32 %v4464_v10, %v3959_v16  ;;  %v5082_v19 = vpop.f32.mrb[45].mxu1 }
0x186c   : > { %v3963_v42 = vadd.f32 %v3960_v41, %v5919_v27  ;;  %v4072_v27 = vld [vmem:[#allocation2 + $0x3a0] sm:$0xff] }
0x186d   : > { %v5299_v59 = vpack.c.bf16 %v4073_v56, %v4072_v27  ;;  %v4475_v56 = vld [vmem:[%s6062_s3 + $0x2f] ss:$0 sm:$0xff] }
0x186e   : > { %v3964_v43 = vsel %vm321_vm1, %v3963_v42, 0.0 }
0x186f   : > { %3965 = vadd.xlane.f32.xlu0 %v3964_v43  ;;  %5300 = vmatpush3.bf16.msra.mxu1 %v5299_v59  ;;  %v4476_v59 = vld [vmem:[%s6062_s3 + $0x30] ss:$0 sm:$0xff] }
0x1870   : > { %5301 = vmatprep.subr.bf16.mxu1 %v5471_v0 }
0x1873   : > { %5303 = vmatpush3.bf16.msra.mxu1 %v5302_v39 }
0x1874   : > { %5304 = vmatprep.subr.bf16.mxu1 %v5471_v0 }
0x1877   : > { %5306 = vmatpush3.bf16.msra.mxu1 %v5305_v62 }
0x1878   : > { %5307 = vmatprep.subr.bf16.mxu1 %v5471_v0 }
0x187b   : > { %5309 = vmatpush3.bf16.msra.mxu1 %v5308_v17 }
0x18fc   : > { %v3966_v44 = vpop.xlane.xlu0 %3965 }
0x18fd   : > { %v3967_v45 = vmul.f32 0.03125, %v3966_v44  ;;  %v4209_v44 = vld [vmem:[#allocation2 + $0x3e0] sm:$0xff] }
0x18ff   : > { %v3968_v46 = vsub.f32 %v3963_v42, %v3967_v45  ;;  %v4210_v45 = vld [vmem:[#allocation2 + $0x3e8] sm:$0xff] }
0x1901   : > { %v3969_v47 = vmul.f32 %v3968_v46, %v3968_v46 }
0x1903   : > { %v3970_v49 = vsel %vm321_vm1, %v3969_v47, 0.0  ;;  %v4211_v47 = vld [vmem:[#allocation2 + $0x3f0] sm:$0xff] }
0x1904   : > { %3971 = vadd.xlane.f32.xlu1 %v3970_v49  ;;  %v4212_v49 = vld [vmem:[#allocation2 + $0x3f8] sm:$0xff] }
0x1905   : > { %v5314_v50 = vpack.c.bf16 %v4212_v49, %v4211_v47 }
0x1991   : > { %v3972_v63 = vpop.xlane.xlu1 %3971 }
0x1992   : > { %v3973_v2 = vmul.f32 0.03125, %v3972_v63 }
0x1994   : > { %v3974_v4 = vadd.f32 1e-05, %v3973_v2 }
0x1996   : > { %5418 = vrsqrt.f32 %v3974_v4 }
0x19a0   : > { %v5419_v5 = vpop.eup %5418 }
0x19a1   : > { %v3976_v7 = vmul.f32 %v5419_v5, %v3968_v46  ;;  %v5311_v46 = vpack.c.bf16 %v4210_v45, %v4209_v44 }
0x19a3   : > { %v3982_v11 = vmul.f32 %v4466_v6, %v3976_v7 }
0x19a5   : > { %v3988_v13 = vadd.f32 %v4467_v8, %v3982_v11 }
0x19a7   : > { %5092 = vmatmul.mubr.msk.f32.vlgmr.msra.gmra.mrb[24].mxu0 %vm321_vm1, %v3988_v13 }
0x19a8   : > { %5121 = vmatprep.mubr.msk.f32.mxu0 %vm5472_vm0, %v5473_v1  ;;  %5312 = vmatpush3.bf16.msra.mxu0 %v5311_v46 }
0x19a9   : > { %5313 = vmatprep.subr.bf16.mxu0 %v5471_v0 }
0x19ac   : > { %5315 = vmatpush3.bf16.msra.mxu0 %v5314_v50 }
0x1a7a   : > { %v4067_v12 = vpop.f32.mrb[24].mxu0 }
0x1a7b   : > { %v4068_v3 = vadd.f32 %v4468_v18, %v4067_v12  ;;  %v5093_v20 = vpop.f32.mrb[25].mxu0 }
0x1a7d   : > { %v4071_v21 = vmax.f32 %v4068_v3, 0.0 }
0x1a7f   : > { %5111 = vmatmul.mubr.msk.f32.vlgmr.msra.gmra.mrb[46].mxu1 %vm600_vm2, %v4071_v21 }
0x1b52   : > { %v4154_v23 = vpop.f32.mrb[46].mxu1 }
0x1b53   : > { %v4155_v1 = vadd.f32 %v4470_v22, %v4154_v23  ;;  %v5112_v24 = vpop.f32.mrb[47].mxu1 }
0x1b55   : > { %v4158_v9 = vadd.f32 %v4155_v1, %v3988_v13 }
0x1b57   : > { %v4159_v25 = vsel %vm321_vm1, %v4158_v9, 0.0 }
0x1b58   : > { %4160 = vadd.xlane.f32.xlu0 %v4159_v25 }
0x1be5   : > { %v4161_v26 = vpop.xlane.xlu0 %4160 }
0x1be6   : > { %v4162_v28 = vmul.f32 0.03125, %v4161_v26 }
0x1be8   : > { %v4163_v29 = vsub.f32 %v4158_v9, %v4162_v28 }
0x1bea   : > { %v4164_v30 = vmul.f32 %v4163_v29, %v4163_v29 }
0x1bec   : > { %v4165_v31 = vsel %vm321_vm1, %v4164_v30, 0.0 }
0x1bed   : > { %4166 = vadd.xlane.f32.xlu1 %v4165_v31 }
0x1c7a   : > { %v4167_v32 = vpop.xlane.xlu1 %4166 }
0x1c7b   : > { %v4168_v33 = vmul.f32 0.03125, %v4167_v32 }
0x1c7d   : > { %v4169_v34 = vadd.f32 1e-05, %v4168_v33 }
0x1c7f   : > { %5420 = vrsqrt.f32 %v4169_v34 }
0x1c89   : > { %v5421_v35 = vpop.eup %5420 }
0x1c8a   : > { %v4171_v36 = vmul.f32 %v5421_v35, %v4163_v29 }
0x1c8c   : > { %v4177_v38 = vmul.f32 %v4472_v58, %v4171_v36 }
0x1c8e   : > { %v4183_v40 = vadd.f32 %v4473_v37, %v4177_v38 }
0x1c90   : > { %v4184_v10 = vsel %vm321_vm1, %v4183_v40, 0.0 }
0x1c91   : > { %4185 = vadd.xlane.f32.xlu0 %v4184_v10 }
0x1d1e   : > { %v4186_v16 = vpop.xlane.xlu0 %4185 }
0x1d1f   : > { %v4187_v41 = vmul.f32 0.03125, %v4186_v16 }
0x1d21   : > { %v4188_v19 = vsub.f32 %v4183_v40, %v4187_v41 }
0x1d23   : > { %v4189_v42 = vmul.f32 %v4188_v19, %v4188_v19 }
0x1d25   : > { %v4190_v43 = vsel %vm321_vm1, %v4189_v42, 0.0 }
0x1d26   : > { %4191 = vadd.xlane.f32.xlu1 %v4190_v43 }
0x1db3   : > { %v4192_v51 = vpop.xlane.xlu1 %4191 }
0x1db4   : > { %v4193_v52 = vmul.f32 0.03125, %v4192_v51 }
0x1db6   : > { %v4194_v48 = vadd.f32 1e-05, %v4193_v52 }
0x1db8   : > { %5422 = vrsqrt.f32 %v4194_v48 }
0x1dc2   : > { %v5423_v53 = vpop.eup %5422 }
0x1dc3   : > { %v4196_v27 = vmul.f32 %v5423_v53, %v4188_v19 }
0x1dc5   : > { %v4202_v0 = vmul.f32 %v4474_v54, %v4196_v27 }
0x1dc7   : > { %v4208_v57 = vadd.f32 %v4475_v56, %v4202_v0 }
0x1dc9   : > { %5122 = vmatmul.mubr.msk.f32.vlgmr.msra.gmra.mrb[26].mxu0 %vm321_vm1, %v4208_v57 }
0x1e9c   : > { %v4287_v60 = vpop.f32.mrb[26].mxu0 }
0x1e9d   : > { %v4288_v39 = vadd.f32 %v4476_v59, %v4287_v60  ;;  %v5123_v61 = vpop.f32.mrb[27].mxu0 }
0x1e9f   : > { %4292 = vst.msk [vmem:[%s224_s12] sm:$0xff] %vm4291_vm4, %v4288_v39 }
0x1ea0 PF: > { %s15_s15 = sadd.s32 1, %s5466_s15  }
0x1ea1   : > { %p12_p3 = scmp.ge.s32.totalorder %s15_s15, 4  }
0x1ea3   :  { %14 = sbr.rel (!%p12_p3) target bundleno = 1 (0x1), region = 74 }
0x1eaa   :  { %4312 = vsyncpa [#allocation3], 1 }
0x1eab   :  { %4314 = vsyncpa [#allocation3 + $0x1], 1 }

</bundles_post_ra>
